<compile_context>
chip_gen: v5e
topology: v5e:2x2
jax: 0.10.0
libtpu: 0.0.40
codegen_flags: <defaults>
</compile_context>

<pallas_src>
import functools
import math

import jax
import jax.numpy as jnp
from jax.experimental import pallas as pl
from jax.experimental.pallas import tpu as pltpu

# bf16 weights for the MXU matmuls; fp32 accumulation & elementwise math.
PARAM_DTYPE = jnp.bfloat16


def encoder_kernel(x_ref, mask_ref,
                   wqkv_ref, bqkv_ref, wo_ref, bo_ref,
                   g1_ref, be1_ref,
                   w1_ref, b1_ref, w2_ref, b2_ref,
                   g2_ref, be2_ref,
                   o_ref,
                   act_ref, attn_ref,
                   *, num_heads, batch, seq):
    """One EncoderBlock per grid step; grid = (layer,).

    The running activation for all batch rows lives in `act_ref`
    ((B*S, D) fp32 VMEM) and is carried across layers; HBM is touched only at
    layer 0 (read x) and the last layer (write output).  Per-layer weights are
    selected by the index_map and double-buffered by the Pallas pipeline, and
    are fetched exactly once per layer (not once per batch element).
    """
    l = pl.program_id(0)
    n_layers = pl.num_programs(0)

    @pl.when(l == 0)
    def _():
        act_ref[...] = x_ref[...].astype(jnp.float32)

    x = act_ref[...]                       # (B*S, D) fp32, resident across layers
    N, D = x.shape
    H, B, S = num_heads, batch, seq
    Dh = D // H
    cdt = wqkv_ref.dtype                   # matmul compute dtype (bf16 or fp32)

    # Additive attention bias over key positions: 0 where attend, -1e9 where masked.
    bias = (mask_ref[...].astype(jnp.float32) - 1.0) * jnp.float32(1e9)   # (B, S)

    # ---- fused QKV projection: one wide (B*S,D)x(D,3D) MXU matmul ---------
    # (1/sqrt(Dh) is already folded into Wq/bq at stacking time.)
    qkv = (jnp.dot(x.astype(cdt), wqkv_ref[0],
                   preferred_element_type=jnp.float32)
           + bqkv_ref[0].astype(jnp.float32))                             # (N, 3D) fp32
    q = qkv[:, :D]
    k = qkv[:, D:2 * D]
    v = qkv[:, 2 * D:]

    # ---- per (batch, head) attention: 2-D dots, no transposes, no concat --
    # Head results are slice-stored straight into attn_ref so only one head's
    # (S,S)/(S,Dh) temporaries are live at a time.
    for b in range(B):                     # static unroll, B small
        rows = slice(b * S, (b + 1) * S)
        bias_b = bias[b:b + 1, :]          # (1, S) -> broadcasts over (S, S)
        for h in range(H):                 # static unroll, H small
            cols = slice(h * Dh, (h + 1) * Dh)
            qh = q[rows, cols].astype(cdt)                                 # (S, Dh)
            kh = k[rows, cols].astype(cdt)
            vh = v[rows, cols].astype(cdt)
            # qh @ kh^T without materializing a transpose (contract axis 1 of both).
            s_h = jax.lax.dot_general(qh, kh, (((1,), (1,)), ((), ())),
                                      preferred_element_type=jnp.float32) + bias_b
            s_h = s_h - jnp.max(s_h, axis=-1, keepdims=True)
            p_h = jnp.exp(s_h)
            p_h = p_h / jnp.sum(p_h, axis=-1, keepdims=True)               # exact softmax
            attn_ref[rows, cols] = jnp.dot(p_h.astype(cdt), vh,
                                           preferred_element_type=jnp.float32)

    attn = (jnp.dot(attn_ref[...].astype(cdt), wo_ref[0],
                    preferred_element_type=jnp.float32)
            + bo_ref[0].astype(jnp.float32))

    # ---- Residual + LayerNorm 1 (dropout == identity in eval) -------------
    h1 = x + attn
    mu = jnp.mean(h1, axis=-1, keepdims=True)
    var = jnp.mean((h1 - mu) * (h1 - mu), axis=-1, keepdims=True)
    h1 = ((h1 - mu) * jax.lax.rsqrt(var + 1e-5) * g1_ref[0].astype(jnp.float32)
          + be1_ref[0].astype(jnp.float32))

    # ---- Position-wise FeedForward -----------------------------------------
    f = (jnp.dot(h1.astype(cdt), w1_ref[0], preferred_element_type=jnp.float32)
         + b1_ref[0].astype(jnp.float32))
    f = jnp.maximum(f, 0.0)
    f = (jnp.dot(f.astype(cdt), w2_ref[0], preferred_element_type=jnp.float32)
         + b2_ref[0].astype(jnp.float32))

    # ---- Residual + LayerNorm 2 --------------------------------------------
    h2 = h1 + f
    mu2 = jnp.mean(h2, axis=-1, keepdims=True)
    var2 = jnp.mean((h2 - mu2) * (h2 - mu2), axis=-1, keepdims=True)
    out = ((h2 - mu2) * jax.lax.rsqrt(var2 + 1e-5) * g2_ref[0].astype(jnp.float32)
           + be2_ref[0].astype(jnp.float32))

    act_ref[...] = out                     # carry to next layer

    @pl.when(l == n_layers - 1)
    def _():
        o_ref[...] = act_ref[...].astype(o_ref.dtype)


def stack_layer_params(layer_params, num_heads, weight_dtype=PARAM_DTYPE):
    """Stack per-layer params along a leading layer axis.

    Fuses Q/K/V weights into one (D, 3D) matrix and folds the 1/sqrt(Dh)
    attention scale into Wq / bq so no per-layer scaling is needed in-kernel.
    Big matmul weights are cast to `weight_dtype` (bf16); biases and LayerNorm
    parameters stay fp32.
    """
    d_model = layer_params[0]['wq'].shape[0]
    d_head = d_model // num_heads
    scale = jnp.float32(1.0 / math.sqrt(d_head))

    def stk(name, dtype):
        return jnp.stack([p[name] for p in layer_params], axis=0).astype(dtype)

    wqkv = jnp.stack(
        [jnp.concatenate([p['wq'] * scale, p['wk'], p['wv']], axis=1)
         for p in layer_params], axis=0).astype(weight_dtype)            # (L, D, 3D)
    bqkv = jnp.stack(
        [jnp.concatenate([p['bq'] * scale, p['bk'], p['bv']], axis=1)
         for p in layer_params], axis=0).astype(jnp.float32)             # (L, 1, 3D)

    return dict(
        wqkv=wqkv, bqkv=bqkv,
        wo=stk('wo', weight_dtype), bo=stk('bo', jnp.float32),
        g1=stk('g1', jnp.float32), be1=stk('be1', jnp.float32),
        w1=stk('w1', weight_dtype), b1=stk('b1', jnp.float32),
        w2=stk('w2', weight_dtype), b2=stk('b2', jnp.float32),
        g2=stk('g2', jnp.float32), be2=stk('be2', jnp.float32),
    )


def _vmem_limit_bytes():
    """Conservative VMEM limit: <= 3/4 of physical (64 MiB on v7x, 128 MiB v5e/v6e)."""
    try:
        cap = int(pltpu.get_tpu_info().vmem_capacity_bytes)
        return min(cap * 3 // 4, 96 * 1024 * 1024)
    except Exception:
        return 48 * 1024 * 1024


def encoder(x, mask, stacked, num_heads):
    """Full Encoder (all layers) in one pallas_call; grid = (layer,)."""
    B, S, D = x.shape
    L = stacked['wqkv'].shape[0]
    F = stacked['w1'].shape[-1]
    H = num_heads
    N = B * S

    # Flatten batch*seq so every matmul is one big (N, D) x (D, *) MXU call
    # and weights are fetched once per layer (no batch grid axis).
    x2 = x.reshape(N, D)
    mask2 = mask.reshape(B, S)

    def wspec(shape):
        # per-layer weight block: pick layer l, full extent on remaining dims
        nrest = len(shape) - 1
        return pl.BlockSpec((1,) + tuple(shape[1:]),
                            lambda l, _n=nrest: (l,) + (0,) * _n)

    in_specs = [
        pl.BlockSpec((N, D), lambda l: (0, 0)),                # x (resident)
        pl.BlockSpec((B, S), lambda l: (0, 0)),                # mask (resident)
        wspec((L, D, 3 * D)), wspec((L, 1, 3 * D)),            # Wqkv, bqkv
        wspec((L, D, D)),     wspec((L, 1, D)),                # Wo, bo
        wspec((L, 1, D)),     wspec((L, 1, D)),                # LN1 gamma, beta
        wspec((L, D, F)),     wspec((L, 1, F)),                # W1, b1
        wspec((L, F, D)),     wspec((L, 1, D)),                # W2, b2
        wspec((L, 1, D)),     wspec((L, 1, D)),                # LN2 gamma, beta
    ]

    # Advisory cost estimate matching the actual DMA pattern (weights read once).
    weight_bytes = sum(int(v.size) * jnp.dtype(v.dtype).itemsize
                       for v in stacked.values())
    act_bytes = (2 * N * D * jnp.dtype(x.dtype).itemsize
                 + B * S * jnp.dtype(mask.dtype).itemsize)
    flops_per_layer = (2 * N * D * 3 * D          # fused QKV
                       + 4 * N * S * D            # QK^T + PV (all heads, all batches)
                       + 2 * N * D * D            # output projection
                       + 4 * N * D * F)           # FFN (two matmuls)
    cost = pl.CostEstimate(
        flops=int(L * flops_per_layer),
        transcendentals=int(L * (B * H * S * S + 2 * N)),
        bytes_accessed=int(weight_bytes + act_bytes),
    )

    kernel = functools.partial(encoder_kernel, num_heads=H, batch=B, seq=S)

    out = pl.pallas_call(
        kernel,
        out_shape=jax.ShapeDtypeStruct((N, D), x.dtype),
        grid=(L,),
        in_specs=in_specs,
        out_specs=pl.BlockSpec((N, D), lambda l: (0, 0)),
        scratch_shapes=[pltpu.VMEM((N, D), jnp.float32),       # resident activation
                        pltpu.VMEM((N, D), jnp.float32)],      # attention head outputs
        compiler_params=pltpu.CompilerParams(
            dimension_semantics=("arbitrary",),
            vmem_limit_bytes=_vmem_limit_bytes(),
        ),
        cost_estimate=cost,
    )(x2, mask2,
      stacked['wqkv'], stacked['bqkv'], stacked['wo'], stacked['bo'],
      stacked['g1'], stacked['be1'],
      stacked['w1'], stacked['b1'], stacked['w2'], stacked['b2'],
      stacked['g2'], stacked['be2'])

    return out.reshape(B, S, D)


def init_layer_params(key, d_model, d_ff):
    ks = jax.random.split(key, 8)
    scale = 0.02

    def lin(k, fan_in, fan_out):
        return scale * jax.random.normal(k, (fan_in, fan_out), jnp.float32)

    return dict(
        wq=lin(ks[0], d_model, d_model), bq=jnp.zeros((1, d_model), jnp.float32),
        wk=lin(ks[1], d_model, d_model), bk=jnp.zeros((1, d_model), jnp.float32),
        wv=lin(ks[2], d_model, d_model), bv=jnp.zeros((1, d_model), jnp.float32),
        wo=lin(ks[3], d_model, d_model), bo=jnp.zeros((1, d_model), jnp.float32),
        g1=jnp.ones((1, d_model), jnp.float32), be1=jnp.zeros((1, d_model), jnp.float32),
        w1=lin(ks[4], d_model, d_ff), b1=jnp.zeros((1, d_ff), jnp.float32),
        w2=lin(ks[5], d_ff, d_model), b2=jnp.zeros((1, d_model), jnp.float32),
        g2=jnp.ones((1, d_model), jnp.float32), be2=jnp.zeros((1, d_model), jnp.float32),
    )


if __name__ == "__main__":
    # Small shapes consistent with the Encoder module's forward.
    # (Real configs should use D a multiple of 128 and B*S a multiple of 8/16
    #  for full vreg/MXU utilization.)
    num_layers, d_model, num_heads, d_ff = 2, 32, 4, 64
    B, S = 2, 8

    key = jax.random.PRNGKey(0)
    k_x, *layer_keys = jax.random.split(key, num_layers + 1)

    x = jax.random.normal(k_x, (B, S, d_model), jnp.float32)
    # mask: 1 = attend, 0 = masked; mask out the last 2 key positions of batch 1.
    mask = jnp.ones((B, 1, S), jnp.float32)
    mask = mask.at[1, :, -2:].set(0.0)

    layer_params = [init_layer_params(k, d_model, d_ff) for k in layer_keys]
    stacked = stack_layer_params(layer_params, num_heads)

    out = encoder(x, mask, stacked, num_heads)
    jax.block_until_ready(out)
    assert out.shape == (B, S, d_model)
    print("KERNEL_OK")
</pallas_src>

<mosaic_0001>
module attributes {stable_mosaic.version = 11 : i64} {
  func.func @encoder_kernel(%arg0: i32, %arg1: memref<16x32xf32, #tpu.memory_space<vmem>>, %arg2: memref<2x8xf32, #tpu.memory_space<vmem>>, %arg3: memref<1x32x96xbf16, #tpu.memory_space<vmem>>, %arg4: memref<1x1x96xf32, #tpu.memory_space<vmem>>, %arg5: memref<1x32x32xbf16, #tpu.memory_space<vmem>>, %arg6: memref<1x1x32xf32, #tpu.memory_space<vmem>>, %arg7: memref<1x1x32xf32, #tpu.memory_space<vmem>>, %arg8: memref<1x1x32xf32, #tpu.memory_space<vmem>>, %arg9: memref<1x32x64xbf16, #tpu.memory_space<vmem>>, %arg10: memref<1x1x64xf32, #tpu.memory_space<vmem>>, %arg11: memref<1x64x32xbf16, #tpu.memory_space<vmem>>, %arg12: memref<1x1x32xf32, #tpu.memory_space<vmem>>, %arg13: memref<1x1x32xf32, #tpu.memory_space<vmem>>, %arg14: memref<1x1x32xf32, #tpu.memory_space<vmem>>, %arg15: memref<16x32xf32, #tpu.memory_space<vmem>>, %arg16: memref<16x32xf32, #tpu.memory_space<vmem>>, %arg17: memref<16x32xf32, #tpu.memory_space<vmem>>) attributes {dimension_semantics = [#tpu.dimension_semantics<arbitrary>], iteration_bounds = array<i64: 2>, scalar_prefetch = 0 : i64, scratch_operands = 2 : i64, tpu.core_type = #tpu.core_type<tc>, window_params = [{pipeline_mode = #tpu.pipeline_mode<synchronous>, transform_indices = @transform_0, window_bounds = array<i64: 16, 32>}, {pipeline_mode = #tpu.pipeline_mode<synchronous>, transform_indices = @transform_1, window_bounds = array<i64: 2, 8>}, {transform_indices = @transform_2, window_bounds = array<i64: 1, 32, 96>}, {transform_indices = @transform_3, window_bounds = array<i64: 1, 1, 96>}, {transform_indices = @transform_4, window_bounds = array<i64: 1, 32, 32>}, {transform_indices = @transform_5, window_bounds = array<i64: 1, 1, 32>}, {transform_indices = @transform_6, window_bounds = array<i64: 1, 1, 32>}, {transform_indices = @transform_7, window_bounds = array<i64: 1, 1, 32>}, {transform_indices = @transform_8, window_bounds = array<i64: 1, 32, 64>}, {transform_indices = @transform_9, window_bounds = array<i64: 1, 1, 64>}, {transform_indices = @transform_10, window_bounds = array<i64: 1, 64, 32>}, {transform_indices = @transform_11, window_bounds = array<i64: 1, 1, 32>}, {transform_indices = @transform_12, window_bounds = array<i64: 1, 1, 32>}, {transform_indices = @transform_13, window_bounds = array<i64: 1, 1, 32>}, {pipeline_mode = #tpu.pipeline_mode<synchronous>, transform_indices = @transform_14, window_bounds = array<i64: 16, 32>}]} {
    %c0_i32 = arith.constant 0 : i32
    %0 = arith.cmpi eq, %arg0, %c0_i32 : i32
    %1 = arith.extui %0 : i1 to i32
    %c0_i32_0 = arith.constant 0 : i32
    %2 = arith.cmpi ne, %1, %c0_i32_0 : i32
    scf.if %2 {
      %c0_106 = arith.constant 0 : index
      %c0_107 = arith.constant 0 : index
      %279 = vector.load %arg1[%c0_106, %c0_107] : memref<16x32xf32, #tpu.memory_space<vmem>>, vector<16x32xf32>
      %c0_108 = arith.constant 0 : index
      %c0_109 = arith.constant 0 : index
      %280 = vector.load %arg16[%c0_108, %c0_109] : memref<16x32xf32, #tpu.memory_space<vmem>>, vector<16x32xf32>
      tpu.vector_store %arg16[%c0_108, %c0_109], %279 {strides = array<i32>} : memref<16x32xf32, #tpu.memory_space<vmem>>, vector<16x32xf32>,
    } else {
    }
    %c0 = arith.constant 0 : index
    %c0_1 = arith.constant 0 : index
    %3 = vector.load %arg16[%c0, %c0_1] : memref<16x32xf32, #tpu.memory_space<vmem>>, vector<16x32xf32>
    %c0_2 = arith.constant 0 : index
    %c0_3 = arith.constant 0 : index
    %4 = vector.load %arg2[%c0_2, %c0_3] : memref<2x8xf32, #tpu.memory_space<vmem>>, vector<2x8xf32>
    %cst = arith.constant 1.000000e+00 : f32
    %5 = vector.broadcast %cst : f32 to vector<2x8xf32>
    %6 = arith.subf %4, %5 : vector<2x8xf32>
    %cst_4 = arith.constant 1.000000e+09 : f32
    %7 = vector.broadcast %cst_4 : f32 to vector<2x8xf32>
    %8 = arith.mulf %6, %7 : vector<2x8xf32>
    %9 = arith.truncf %3 : vector<16x32xf32> to vector<16x32xbf16>
    %c0_5 = arith.constant 0 : index
    %c0_6 = arith.constant 0 : index
    %c0_7 = arith.constant 0 : index
    %10 = vector.load %arg3[%c0_5, %c0_6, %c0_7] : memref<1x32x96xbf16, #tpu.memory_space<vmem>>, vector<1x32x96xbf16>
    %11 = vector.shape_cast %10 : vector<1x32x96xbf16> to vector<32x96xbf16>
    %cst_8 = arith.constant dense<0.000000e+00> : vector<16x96xf32>
    %12 = tpu.matmul %9, %11, %cst_8 {dimension_numbers = #tpu.dot_dimension_numbers<[1], [0], [0], [1], [0, 0, 1, 1], [], []>} : vector<16x32xbf16>, vector<32x96xbf16>, vector<16x96xf32> -> vector<16x96xf32>
    %c0_9 = arith.constant 0 : index
    %c0_10 = arith.constant 0 : index
    %c0_11 = arith.constant 0 : index
    %13 = vector.load %arg4[%c0_9, %c0_10, %c0_11] : memref<1x1x96xf32, #tpu.memory_space<vmem>>, vector<1x1x96xf32>
    %14 = vector.shape_cast %13 : vector<1x1x96xf32> to vector<1x96xf32>
    %15 = vector.broadcast %14 : vector<1x96xf32> to vector<16x96xf32>
    %16 = arith.addf %12, %15 : vector<16x96xf32>
    %17 = vector.extract_strided_slice %16 {offsets = [0, 0], sizes = [16, 32], strides = [1, 1]} : vector<16x96xf32> to vector<16x32xf32>
    %18 = vector.extract_strided_slice %16 {offsets = [0, 32], sizes = [16, 32], strides = [1, 1]} : vector<16x96xf32> to vector<16x32xf32>
    %19 = vector.extract_strided_slice %16 {offsets = [0, 64], sizes = [16, 32], strides = [1, 1]} : vector<16x96xf32> to vector<16x32xf32>
    %20 = vector.extract_strided_slice %8 {offsets = [0, 0], sizes = [1, 8], strides = [1, 1]} : vector<2x8xf32> to vector<1x8xf32>
    %21 = vector.extract_strided_slice %17 {offsets = [0, 0], sizes = [8, 8], strides = [1, 1]} : vector<16x32xf32> to vector<8x8xf32>
    %22 = arith.truncf %21 : vector<8x8xf32> to vector<8x8xbf16>
    %23 = vector.extract_strided_slice %18 {offsets = [0, 0], sizes = [8, 8], strides = [1, 1]} : vector<16x32xf32> to vector<8x8xf32>
    %24 = arith.truncf %23 : vector<8x8xf32> to vector<8x8xbf16>
    %25 = vector.extract_strided_slice %19 {offsets = [0, 0], sizes = [8, 8], strides = [1, 1]} : vector<16x32xf32> to vector<8x8xf32>
    %26 = arith.truncf %25 : vector<8x8xf32> to vector<8x8xbf16>
    %cst_12 = arith.constant dense<0.000000e+00> : vector<8x8xf32>
    %27 = tpu.matmul %22, %24, %cst_12 {dimension_numbers = #tpu.dot_dimension_numbers<[1], [1], [0], [0], [0, 0, 1, 0], [], []>} : vector<8x8xbf16>, vector<8x8xbf16>, vector<8x8xf32> -> vector<8x8xf32>
    %28 = vector.broadcast %20 : vector<1x8xf32> to vector<8x8xf32>
    %29 = arith.addf %27, %28 : vector<8x8xf32>
    %cst_13 = arith.constant dense<0xFF800000> : vector<8xf32>
    %30 = vector.multi_reduction <maximumf>, %29, %cst_13 [1] : vector<8x8xf32> to vector<8xf32>
    %31 = vector.shape_cast %30 : vector<8xf32> to vector<8x1xf32>
    %32 = vector.broadcast %31 : vector<8x1xf32> to vector<8x8xf32>
    %33 = arith.subf %29, %32 : vector<8x8xf32>
    %34 = math.exp %33 : vector<8x8xf32>
    %cst_14 = arith.constant dense<0.000000e+00> : vector<8xf32>
    %35 = vector.multi_reduction <add>, %34, %cst_14 [1] : vector<8x8xf32> to vector<8xf32>
    %36 = vector.shape_cast %35 : vector<8xf32> to vector<8x1xf32>
    %37 = vector.broadcast %36 : vector<8x1xf32> to vector<8x8xf32>
    %38 = arith.divf %34, %37 : vector<8x8xf32>
    %39 = arith.truncf %38 : vector<8x8xf32> to vector<8x8xbf16>
    %cst_15 = arith.constant dense<0.000000e+00> : vector<8x8xf32>
    %40 = tpu.matmul %39, %26, %cst_15 {dimension_numbers = #tpu.dot_dimension_numbers<[1], [0], [0], [1], [0, 0, 1, 1], [], []>} : vector<8x8xbf16>, vector<8x8xbf16>, vector<8x8xf32> -> vector<8x8xf32>
    %c0_16 = arith.constant 0 : index
    %c0_17 = arith.constant 0 : index
    %41 = vector.load %arg17[%c0_16, %c0_17] : memref<16x32xf32, #tpu.memory_space<vmem>>, vector<8x8xf32>
    tpu.vector_store %arg17[%c0_16, %c0_17], %40 {strides = array<i32>} : memref<16x32xf32, #tpu.memory_space<vmem>>, vector<8x8xf32>,
    %42 = vector.extract_strided_slice %17 {offsets = [0, 8], sizes = [8, 8], strides = [1, 1]} : vector<16x32xf32> to vector<8x8xf32>
    %43 = arith.truncf %42 : vector<8x8xf32> to vector<8x8xbf16>
    %44 = vector.extract_strided_slice %18 {offsets = [0, 8], sizes = [8, 8], strides = [1, 1]} : vector<16x32xf32> to vector<8x8xf32>
    %45 = arith.truncf %44 : vector<8x8xf32> to vector<8x8xbf16>
    %46 = vector.extract_strided_slice %19 {offsets = [0, 8], sizes = [8, 8], strides = [1, 1]} : vector<16x32xf32> to vector<8x8xf32>
    %47 = arith.truncf %46 : vector<8x8xf32> to vector<8x8xbf16>
    %cst_18 = arith.constant dense<0.000000e+00> : vector<8x8xf32>
    %48 = tpu.matmul %43, %45, %cst_18 {dimension_numbers = #tpu.dot_dimension_numbers<[1], [1], [0], [0], [0, 0, 1, 0], [], []>} : vector<8x8xbf16>, vector<8x8xbf16>, vector<8x8xf32> -> vector<8x8xf32>
    %49 = vector.broadcast %20 : vector<1x8xf32> to vector<8x8xf32>
    %50 = arith.addf %48, %49 : vector<8x8xf32>
    %cst_19 = arith.constant dense<0xFF800000> : vector<8xf32>
    %51 = vector.multi_reduction <maximumf>, %50, %cst_19 [1] : vector<8x8xf32> to vector<8xf32>
    %52 = vector.shape_cast %51 : vector<8xf32> to vector<8x1xf32>
    %53 = vector.broadcast %52 : vector<8x1xf32> to vector<8x8xf32>
    %54 = arith.subf %50, %53 : vector<8x8xf32>
    %55 = math.exp %54 : vector<8x8xf32>
    %cst_20 = arith.constant dense<0.000000e+00> : vector<8xf32>
    %56 = vector.multi_reduction <add>, %55, %cst_20 [1] : vector<8x8xf32> to vector<8xf32>
    %57 = vector.shape_cast %56 : vector<8xf32> to vector<8x1xf32>
    %58 = vector.broadcast %57 : vector<8x1xf32> to vector<8x8xf32>
    %59 = arith.divf %55, %58 : vector<8x8xf32>
    %60 = arith.truncf %59 : vector<8x8xf32> to vector<8x8xbf16>
    %cst_21 = arith.constant dense<0.000000e+00> : vector<8x8xf32>
    %61 = tpu.matmul %60, %47, %cst_21 {dimension_numbers = #tpu.dot_dimension_numbers<[1], [0], [0], [1], [0, 0, 1, 1], [], []>} : vector<8x8xbf16>, vector<8x8xbf16>, vector<8x8xf32> -> vector<8x8xf32>
    %c0_22 = arith.constant 0 : index
    %c8 = arith.constant 8 : index
    %62 = vector.load %arg17[%c0_22, %c8] : memref<16x32xf32, #tpu.memory_space<vmem>>, vector<8x8xf32>
    tpu.vector_store %arg17[%c0_22, %c8], %61 {strides = array<i32>} : memref<16x32xf32, #tpu.memory_space<vmem>>, vector<8x8xf32>,
    %63 = vector.extract_strided_slice %17 {offsets = [0, 16], sizes = [8, 8], strides = [1, 1]} : vector<16x32xf32> to vector<8x8xf32>
    %64 = arith.truncf %63 : vector<8x8xf32> to vector<8x8xbf16>
    %65 = vector.extract_strided_slice %18 {offsets = [0, 16], sizes = [8, 8], strides = [1, 1]} : vector<16x32xf32> to vector<8x8xf32>
    %66 = arith.truncf %65 : vector<8x8xf32> to vector<8x8xbf16>
    %67 = vector.extract_strided_slice %19 {offsets = [0, 16], sizes = [8, 8], strides = [1, 1]} : vector<16x32xf32> to vector<8x8xf32>
    %68 = arith.truncf %67 : vector<8x8xf32> to vector<8x8xbf16>
    %cst_23 = arith.constant dense<0.000000e+00> : vector<8x8xf32>
    %69 = tpu.matmul %64, %66, %cst_23 {dimension_numbers = #tpu.dot_dimension_numbers<[1], [1], [0], [0], [0, 0, 1, 0], [], []>} : vector<8x8xbf16>, vector<8x8xbf16>, vector<8x8xf32> -> vector<8x8xf32>
    %70 = vector.broadcast %20 : vector<1x8xf32> to vector<8x8xf32>
    %71 = arith.addf %69, %70 : vector<8x8xf32>
    %cst_24 = arith.constant dense<0xFF800000> : vector<8xf32>
    %72 = vector.multi_reduction <maximumf>, %71, %cst_24 [1] : vector<8x8xf32> to vector<8xf32>
    %73 = vector.shape_cast %72 : vector<8xf32> to vector<8x1xf32>
    %74 = vector.broadcast %73 : vector<8x1xf32> to vector<8x8xf32>
    %75 = arith.subf %71, %74 : vector<8x8xf32>
    %76 = math.exp %75 : vector<8x8xf32>
    %cst_25 = arith.constant dense<0.000000e+00> : vector<8xf32>
    %77 = vector.multi_reduction <add>, %76, %cst_25 [1] : vector<8x8xf32> to vector<8xf32>
    %78 = vector.shape_cast %77 : vector<8xf32> to vector<8x1xf32>
    %79 = vector.broadcast %78 : vector<8x1xf32> to vector<8x8xf32>
    %80 = arith.divf %76, %79 : vector<8x8xf32>
    %81 = arith.truncf %80 : vector<8x8xf32> to vector<8x8xbf16>
    %cst_26 = arith.constant dense<0.000000e+00> : vector<8x8xf32>
    %82 = tpu.matmul %81, %68, %cst_26 {dimension_numbers = #tpu.dot_dimension_numbers<[1], [0], [0], [1], [0, 0, 1, 1], [], []>} : vector<8x8xbf16>, vector<8x8xbf16>, vector<8x8xf32> -> vector<8x8xf32>
    %c0_27 = arith.constant 0 : index
    %c16 = arith.constant 16 : index
    %83 = vector.load %arg17[%c0_27, %c16] : memref<16x32xf32, #tpu.memory_space<vmem>>, vector<8x8xf32>
    tpu.vector_store %arg17[%c0_27, %c16], %82 {strides = array<i32>} : memref<16x32xf32, #tpu.memory_space<vmem>>, vector<8x8xf32>,
    %84 = vector.extract_strided_slice %17 {offsets = [0, 24], sizes = [8, 8], strides = [1, 1]} : vector<16x32xf32> to vector<8x8xf32>
    %85 = arith.truncf %84 : vector<8x8xf32> to vector<8x8xbf16>
    %86 = vector.extract_strided_slice %18 {offsets = [0, 24], sizes = [8, 8], strides = [1, 1]} : vector<16x32xf32> to vector<8x8xf32>
    %87 = arith.truncf %86 : vector<8x8xf32> to vector<8x8xbf16>
    %88 = vector.extract_strided_slice %19 {offsets = [0, 24], sizes = [8, 8], strides = [1, 1]} : vector<16x32xf32> to vector<8x8xf32>
    %89 = arith.truncf %88 : vector<8x8xf32> to vector<8x8xbf16>
    %cst_28 = arith.constant dense<0.000000e+00> : vector<8x8xf32>
    %90 = tpu.matmul %85, %87, %cst_28 {dimension_numbers = #tpu.dot_dimension_numbers<[1], [1], [0], [0], [0, 0, 1, 0], [], []>} : vector<8x8xbf16>, vector<8x8xbf16>, vector<8x8xf32> -> vector<8x8xf32>
    %91 = vector.broadcast %20 : vector<1x8xf32> to vector<8x8xf32>
    %92 = arith.addf %90, %91 : vector<8x8xf32>
    %cst_29 = arith.constant dense<0xFF800000> : vector<8xf32>
    %93 = vector.multi_reduction <maximumf>, %92, %cst_29 [1] : vector<8x8xf32> to vector<8xf32>
    %94 = vector.shape_cast %93 : vector<8xf32> to vector<8x1xf32>
    %95 = vector.broadcast %94 : vector<8x1xf32> to vector<8x8xf32>
    %96 = arith.subf %92, %95 : vector<8x8xf32>
    %97 = math.exp %96 : vector<8x8xf32>
    %cst_30 = arith.constant dense<0.000000e+00> : vector<8xf32>
    %98 = vector.multi_reduction <add>, %97, %cst_30 [1] : vector<8x8xf32> to vector<8xf32>
    %99 = vector.shape_cast %98 : vector<8xf32> to vector<8x1xf32>
    %100 = vector.broadcast %99 : vector<8x1xf32> to vector<8x8xf32>
    %101 = arith.divf %97, %100 : vector<8x8xf32>
    %102 = arith.truncf %101 : vector<8x8xf32> to vector<8x8xbf16>
    %cst_31 = arith.constant dense<0.000000e+00> : vector<8x8xf32>
    %103 = tpu.matmul %102, %89, %cst_31 {dimension_numbers = #tpu.dot_dimension_numbers<[1], [0], [0], [1], [0, 0, 1, 1], [], []>} : vector<8x8xbf16>, vector<8x8xbf16>, vector<8x8xf32> -> vector<8x8xf32>
    %c0_32 = arith.constant 0 : index
    %c24 = arith.constant 24 : index
    %104 = vector.load %arg17[%c0_32, %c24] : memref<16x32xf32, #tpu.memory_space<vmem>>, vector<8x8xf32>
    tpu.vector_store %arg17[%c0_32, %c24], %103 {strides = array<i32>} : memref<16x32xf32, #tpu.memory_space<vmem>>, vector<8x8xf32>,
    %105 = vector.extract_strided_slice %8 {offsets = [1, 0], sizes = [1, 8], strides = [1, 1]} : vector<2x8xf32> to vector<1x8xf32>
    %106 = vector.extract_strided_slice %17 {offsets = [8, 0], sizes = [8, 8], strides = [1, 1]} : vector<16x32xf32> to vector<8x8xf32>
    %107 = arith.truncf %106 : vector<8x8xf32> to vector<8x8xbf16>
    %108 = vector.extract_strided_slice %18 {offsets = [8, 0], sizes = [8, 8], strides = [1, 1]} : vector<16x32xf32> to vector<8x8xf32>
    %109 = arith.truncf %108 : vector<8x8xf32> to vector<8x8xbf16>
    %110 = vector.extract_strided_slice %19 {offsets = [8, 0], sizes = [8, 8], strides = [1, 1]} : vector<16x32xf32> to vector<8x8xf32>
    %111 = arith.truncf %110 : vector<8x8xf32> to vector<8x8xbf16>
    %cst_33 = arith.constant dense<0.000000e+00> : vector<8x8xf32>
    %112 = tpu.matmul %107, %109, %cst_33 {dimension_numbers = #tpu.dot_dimension_numbers<[1], [1], [0], [0], [0, 0, 1, 0], [], []>} : vector<8x8xbf16>, vector<8x8xbf16>, vector<8x8xf32> -> vector<8x8xf32>
    %113 = vector.broadcast %105 : vector<1x8xf32> to vector<8x8xf32>
    %114 = arith.addf %112, %113 : vector<8x8xf32>
    %cst_34 = arith.constant dense<0xFF800000> : vector<8xf32>
    %115 = vector.multi_reduction <maximumf>, %114, %cst_34 [1] : vector<8x8xf32> to vector<8xf32>
    %116 = vector.shape_cast %115 : vector<8xf32> to vector<8x1xf32>
    %117 = vector.broadcast %116 : vector<8x1xf32> to vector<8x8xf32>
    %118 = arith.subf %114, %117 : vector<8x8xf32>
    %119 = math.exp %118 : vector<8x8xf32>
    %cst_35 = arith.constant dense<0.000000e+00> : vector<8xf32>
    %120 = vector.multi_reduction <add>, %119, %cst_35 [1] : vector<8x8xf32> to vector<8xf32>
    %121 = vector.shape_cast %120 : vector<8xf32> to vector<8x1xf32>
    %122 = vector.broadcast %121 : vector<8x1xf32> to vector<8x8xf32>
    %123 = arith.divf %119, %122 : vector<8x8xf32>
    %124 = arith.truncf %123 : vector<8x8xf32> to vector<8x8xbf16>
    %cst_36 = arith.constant dense<0.000000e+00> : vector<8x8xf32>
    %125 = tpu.matmul %124, %111, %cst_36 {dimension_numbers = #tpu.dot_dimension_numbers<[1], [0], [0], [1], [0, 0, 1, 1], [], []>} : vector<8x8xbf16>, vector<8x8xbf16>, vector<8x8xf32> -> vector<8x8xf32>
    %c8_37 = arith.constant 8 : index
    %c0_38 = arith.constant 0 : index
    %126 = vector.load %arg17[%c8_37, %c0_38] : memref<16x32xf32, #tpu.memory_space<vmem>>, vector<8x8xf32>
    tpu.vector_store %arg17[%c8_37, %c0_38], %125 {strides = array<i32>} : memref<16x32xf32, #tpu.memory_space<vmem>>, vector<8x8xf32>,
    %127 = vector.extract_strided_slice %17 {offsets = [8, 8], sizes = [8, 8], strides = [1, 1]} : vector<16x32xf32> to vector<8x8xf32>
    %128 = arith.truncf %127 : vector<8x8xf32> to vector<8x8xbf16>
    %129 = vector.extract_strided_slice %18 {offsets = [8, 8], sizes = [8, 8], strides = [1, 1]} : vector<16x32xf32> to vector<8x8xf32>
    %130 = arith.truncf %129 : vector<8x8xf32> to vector<8x8xbf16>
    %131 = vector.extract_strided_slice %19 {offsets = [8, 8], sizes = [8, 8], strides = [1, 1]} : vector<16x32xf32> to vector<8x8xf32>
    %132 = arith.truncf %131 : vector<8x8xf32> to vector<8x8xbf16>
    %cst_39 = arith.constant dense<0.000000e+00> : vector<8x8xf32>
    %133 = tpu.matmul %128, %130, %cst_39 {dimension_numbers = #tpu.dot_dimension_numbers<[1], [1], [0], [0], [0, 0, 1, 0], [], []>} : vector<8x8xbf16>, vector<8x8xbf16>, vector<8x8xf32> -> vector<8x8xf32>
    %134 = vector.broadcast %105 : vector<1x8xf32> to vector<8x8xf32>
    %135 = arith.addf %133, %134 : vector<8x8xf32>
    %cst_40 = arith.constant dense<0xFF800000> : vector<8xf32>
    %136 = vector.multi_reduction <maximumf>, %135, %cst_40 [1] : vector<8x8xf32> to vector<8xf32>
    %137 = vector.shape_cast %136 : vector<8xf32> to vector<8x1xf32>
    %138 = vector.broadcast %137 : vector<8x1xf32> to vector<8x8xf32>
    %139 = arith.subf %135, %138 : vector<8x8xf32>
    %140 = math.exp %139 : vector<8x8xf32>
    %cst_41 = arith.constant dense<0.000000e+00> : vector<8xf32>
    %141 = vector.multi_reduction <add>, %140, %cst_41 [1] : vector<8x8xf32> to vector<8xf32>
    %142 = vector.shape_cast %141 : vector<8xf32> to vector<8x1xf32>
    %143 = vector.broadcast %142 : vector<8x1xf32> to vector<8x8xf32>
    %144 = arith.divf %140, %143 : vector<8x8xf32>
    %145 = arith.truncf %144 : vector<8x8xf32> to vector<8x8xbf16>
    %cst_42 = arith.constant dense<0.000000e+00> : vector<8x8xf32>
    %146 = tpu.matmul %145, %132, %cst_42 {dimension_numbers = #tpu.dot_dimension_numbers<[1], [0], [0], [1], [0, 0, 1, 1], [], []>} : vector<8x8xbf16>, vector<8x8xbf16>, vector<8x8xf32> -> vector<8x8xf32>
    %c8_43 = arith.constant 8 : index
    %c8_44 = arith.constant 8 : index
    %147 = vector.load %arg17[%c8_43, %c8_44] : memref<16x32xf32, #tpu.memory_space<vmem>>, vector<8x8xf32>
    tpu.vector_store %arg17[%c8_43, %c8_44], %146 {strides = array<i32>} : memref<16x32xf32, #tpu.memory_space<vmem>>, vector<8x8xf32>,
    %148 = vector.extract_strided_slice %17 {offsets = [8, 16], sizes = [8, 8], strides = [1, 1]} : vector<16x32xf32> to vector<8x8xf32>
    %149 = arith.truncf %148 : vector<8x8xf32> to vector<8x8xbf16>
    %150 = vector.extract_strided_slice %18 {offsets = [8, 16], sizes = [8, 8], strides = [1, 1]} : vector<16x32xf32> to vector<8x8xf32>
    %151 = arith.truncf %150 : vector<8x8xf32> to vector<8x8xbf16>
    %152 = vector.extract_strided_slice %19 {offsets = [8, 16], sizes = [8, 8], strides = [1, 1]} : vector<16x32xf32> to vector<8x8xf32>
    %153 = arith.truncf %152 : vector<8x8xf32> to vector<8x8xbf16>
    %cst_45 = arith.constant dense<0.000000e+00> : vector<8x8xf32>
    %154 = tpu.matmul %149, %151, %cst_45 {dimension_numbers = #tpu.dot_dimension_numbers<[1], [1], [0], [0], [0, 0, 1, 0], [], []>} : vector<8x8xbf16>, vector<8x8xbf16>, vector<8x8xf32> -> vector<8x8xf32>
    %155 = vector.broadcast %105 : vector<1x8xf32> to vector<8x8xf32>
    %156 = arith.addf %154, %155 : vector<8x8xf32>
    %cst_46 = arith.constant dense<0xFF800000> : vector<8xf32>
    %157 = vector.multi_reduction <maximumf>, %156, %cst_46 [1] : vector<8x8xf32> to vector<8xf32>
    %158 = vector.shape_cast %157 : vector<8xf32> to vector<8x1xf32>
    %159 = vector.broadcast %158 : vector<8x1xf32> to vector<8x8xf32>
    %160 = arith.subf %156, %159 : vector<8x8xf32>
    %161 = math.exp %160 : vector<8x8xf32>
    %cst_47 = arith.constant dense<0.000000e+00> : vector<8xf32>
    %162 = vector.multi_reduction <add>, %161, %cst_47 [1] : vector<8x8xf32> to vector<8xf32>
    %163 = vector.shape_cast %162 : vector<8xf32> to vector<8x1xf32>
    %164 = vector.broadcast %163 : vector<8x1xf32> to vector<8x8xf32>
    %165 = arith.divf %161, %164 : vector<8x8xf32>
    %166 = arith.truncf %165 : vector<8x8xf32> to vector<8x8xbf16>
    %cst_48 = arith.constant dense<0.000000e+00> : vector<8x8xf32>
    %167 = tpu.matmul %166, %153, %cst_48 {dimension_numbers = #tpu.dot_dimension_numbers<[1], [0], [0], [1], [0, 0, 1, 1], [], []>} : vector<8x8xbf16>, vector<8x8xbf16>, vector<8x8xf32> -> vector<8x8xf32>
    %c8_49 = arith.constant 8 : index
    %c16_50 = arith.constant 16 : index
    %168 = vector.load %arg17[%c8_49, %c16_50] : memref<16x32xf32, #tpu.memory_space<vmem>>, vector<8x8xf32>
    tpu.vector_store %arg17[%c8_49, %c16_50], %167 {strides = array<i32>} : memref<16x32xf32, #tpu.memory_space<vmem>>, vector<8x8xf32>,
    %169 = vector.extract_strided_slice %17 {offsets = [8, 24], sizes = [8, 8], strides = [1, 1]} : vector<16x32xf32> to vector<8x8xf32>
    %170 = arith.truncf %169 : vector<8x8xf32> to vector<8x8xbf16>
    %171 = vector.extract_strided_slice %18 {offsets = [8, 24], sizes = [8, 8], strides = [1, 1]} : vector<16x32xf32> to vector<8x8xf32>
    %172 = arith.truncf %171 : vector<8x8xf32> to vector<8x8xbf16>
    %173 = vector.extract_strided_slice %19 {offsets = [8, 24], sizes = [8, 8], strides = [1, 1]} : vector<16x32xf32> to vector<8x8xf32>
    %174 = arith.truncf %173 : vector<8x8xf32> to vector<8x8xbf16>
    %cst_51 = arith.constant dense<0.000000e+00> : vector<8x8xf32>
    %175 = tpu.matmul %170, %172, %cst_51 {dimension_numbers = #tpu.dot_dimension_numbers<[1], [1], [0], [0], [0, 0, 1, 0], [], []>} : vector<8x8xbf16>, vector<8x8xbf16>, vector<8x8xf32> -> vector<8x8xf32>
    %176 = vector.broadcast %105 : vector<1x8xf32> to vector<8x8xf32>
    %177 = arith.addf %175, %176 : vector<8x8xf32>
    %cst_52 = arith.constant dense<0xFF800000> : vector<8xf32>
    %178 = vector.multi_reduction <maximumf>, %177, %cst_52 [1] : vector<8x8xf32> to vector<8xf32>
    %179 = vector.shape_cast %178 : vector<8xf32> to vector<8x1xf32>
    %180 = vector.broadcast %179 : vector<8x1xf32> to vector<8x8xf32>
    %181 = arith.subf %177, %180 : vector<8x8xf32>
    %182 = math.exp %181 : vector<8x8xf32>
    %cst_53 = arith.constant dense<0.000000e+00> : vector<8xf32>
    %183 = vector.multi_reduction <add>, %182, %cst_53 [1] : vector<8x8xf32> to vector<8xf32>
    %184 = vector.shape_cast %183 : vector<8xf32> to vector<8x1xf32>
    %185 = vector.broadcast %184 : vector<8x1xf32> to vector<8x8xf32>
    %186 = arith.divf %182, %185 : vector<8x8xf32>
    %187 = arith.truncf %186 : vector<8x8xf32> to vector<8x8xbf16>
    %cst_54 = arith.constant dense<0.000000e+00> : vector<8x8xf32>
    %188 = tpu.matmul %187, %174, %cst_54 {dimension_numbers = #tpu.dot_dimension_numbers<[1], [0], [0], [1], [0, 0, 1, 1], [], []>} : vector<8x8xbf16>, vector<8x8xbf16>, vector<8x8xf32> -> vector<8x8xf32>
    %c8_55 = arith.constant 8 : index
    %c24_56 = arith.constant 24 : index
    %189 = vector.load %arg17[%c8_55, %c24_56] : memref<16x32xf32, #tpu.memory_space<vmem>>, vector<8x8xf32>
    tpu.vector_store %arg17[%c8_55, %c24_56], %188 {strides = array<i32>} : memref<16x32xf32, #tpu.memory_space<vmem>>, vector<8x8xf32>,
    %c0_57 = arith.constant 0 : index
    %c0_58 = arith.constant 0 : index
    %190 = vector.load %arg17[%c0_57, %c0_58] : memref<16x32xf32, #tpu.memory_space<vmem>>, vector<16x32xf32>
    %191 = arith.truncf %190 : vector<16x32xf32> to vector<16x32xbf16>
    %c0_59 = arith.constant 0 : index
    %c0_60 = arith.constant 0 : index
    %c0_61 = arith.constant 0 : index
    %192 = vector.load %arg5[%c0_59, %c0_60, %c0_61] : memref<1x32x32xbf16, #tpu.memory_space<vmem>>, vector<1x32x32xbf16>
    %193 = vector.shape_cast %192 : vector<1x32x32xbf16> to vector<32x32xbf16>
    %cst_62 = arith.constant dense<0.000000e+00> : vector<16x32xf32>
    %194 = tpu.matmul %191, %193, %cst_62 {dimension_numbers = #tpu.dot_dimension_numbers<[1], [0], [0], [1], [0, 0, 1, 1], [], []>} : vector<16x32xbf16>, vector<32x32xbf16>, vector<16x32xf32> -> vector<16x32xf32>
    %c0_63 = arith.constant 0 : index
    %c0_64 = arith.constant 0 : index
    %c0_65 = arith.constant 0 : index
    %195 = vector.load %arg6[%c0_63, %c0_64, %c0_65] : memref<1x1x32xf32, #tpu.memory_space<vmem>>, vector<1x1x32xf32>
    %196 = vector.shape_cast %195 : vector<1x1x32xf32> to vector<1x32xf32>
    %197 = vector.broadcast %196 : vector<1x32xf32> to vector<16x32xf32>
    %198 = arith.addf %194, %197 : vector<16x32xf32>
    %199 = arith.addf %3, %198 : vector<16x32xf32>
    %cst_66 = arith.constant dense<0.000000e+00> : vector<16xf32>
    %200 = vector.multi_reduction <add>, %199, %cst_66 [1] : vector<16x32xf32> to vector<16xf32>
    %201 = vector.shape_cast %200 : vector<16xf32> to vector<16x1xf32>
    %cst_67 = arith.constant 3.200000e+01 : f32
    %202 = vector.broadcast %cst_67 : f32 to vector<16x1xf32>
    %203 = arith.divf %201, %202 : vector<16x1xf32>
    %204 = vector.broadcast %203 : vector<16x1xf32> to vector<16x32xf32>
    %205 = arith.subf %199, %204 : vector<16x32xf32>
    %206 = vector.broadcast %203 : vector<16x1xf32> to vector<16x32xf32>
    %207 = arith.subf %199, %206 : vector<16x32xf32>
    %208 = arith.mulf %205, %207 : vector<16x32xf32>
    %cst_68 = arith.constant dense<0.000000e+00> : vector<16xf32>
    %209 = vector.multi_reduction <add>, %208, %cst_68 [1] : vector<16x32xf32> to vector<16xf32>
    %210 = vector.shape_cast %209 : vector<16xf32> to vector<16x1xf32>
    %cst_69 = arith.constant 3.200000e+01 : f32
    %211 = vector.broadcast %cst_69 : f32 to vector<16x1xf32>
    %212 = arith.divf %210, %211 : vector<16x1xf32>
    %213 = vector.broadcast %203 : vector<16x1xf32> to vector<16x32xf32>
    %214 = arith.subf %199, %213 : vector<16x32xf32>
    %cst_70 = arith.constant 9.99999974E-6 : f32
    %215 = vector.broadcast %cst_70 : f32 to vector<16x1xf32>
    %216 = arith.addf %212, %215 : vector<16x1xf32>
    %217 = math.rsqrt %216 : vector<16x1xf32>
    %218 = vector.broadcast %217 : vector<16x1xf32> to vector<16x32xf32>
    %219 = arith.mulf %214, %218 : vector<16x32xf32>
    %c0_71 = arith.constant 0 : index
    %c0_72 = arith.constant 0 : index
    %c0_73 = arith.constant 0 : index
    %220 = vector.load %arg7[%c0_71, %c0_72, %c0_73] : memref<1x1x32xf32, #tpu.memory_space<vmem>>, vector<1x1x32xf32>
    %221 = vector.shape_cast %220 : vector<1x1x32xf32> to vector<1x32xf32>
    %222 = vector.broadcast %221 : vector<1x32xf32> to vector<16x32xf32>
    %223 = arith.mulf %219, %222 : vector<16x32xf32>
    %c0_74 = arith.constant 0 : index
    %c0_75 = arith.constant 0 : index
    %c0_76 = arith.constant 0 : index
    %224 = vector.load %arg8[%c0_74, %c0_75, %c0_76] : memref<1x1x32xf32, #tpu.memory_space<vmem>>, vector<1x1x32xf32>
    %225 = vector.shape_cast %224 : vector<1x1x32xf32> to vector<1x32xf32>
    %226 = vector.broadcast %225 : vector<1x32xf32> to vector<16x32xf32>
    %227 = arith.addf %223, %226 : vector<16x32xf32>
    %228 = arith.truncf %227 : vector<16x32xf32> to vector<16x32xbf16>
    %c0_77 = arith.constant 0 : index
    %c0_78 = arith.constant 0 : index
    %c0_79 = arith.constant 0 : index
    %229 = vector.load %arg9[%c0_77, %c0_78, %c0_79] : memref<1x32x64xbf16, #tpu.memory_space<vmem>>, vector<1x32x64xbf16>
    %230 = vector.shape_cast %229 : vector<1x32x64xbf16> to vector<32x64xbf16>
    %cst_80 = arith.constant dense<0.000000e+00> : vector<16x64xf32>
    %231 = tpu.matmul %228, %230, %cst_80 {dimension_numbers = #tpu.dot_dimension_numbers<[1], [0], [0], [1], [0, 0, 1, 1], [], []>} : vector<16x32xbf16>, vector<32x64xbf16>, vector<16x64xf32> -> vector<16x64xf32>
    %c0_81 = arith.constant 0 : index
    %c0_82 = arith.constant 0 : index
    %c0_83 = arith.constant 0 : index
    %232 = vector.load %arg10[%c0_81, %c0_82, %c0_83] : memref<1x1x64xf32, #tpu.memory_space<vmem>>, vector<1x1x64xf32>
    %233 = vector.shape_cast %232 : vector<1x1x64xf32> to vector<1x64xf32>
    %234 = vector.broadcast %233 : vector<1x64xf32> to vector<16x64xf32>
    %235 = arith.addf %231, %234 : vector<16x64xf32>
    %cst_84 = arith.constant 0.000000e+00 : f32
    %236 = vector.broadcast %cst_84 : f32 to vector<16x64xf32>
    %237 = arith.maximumf %235, %236 : vector<16x64xf32>
    %238 = arith.truncf %237 : vector<16x64xf32> to vector<16x64xbf16>
    %c0_85 = arith.constant 0 : index
    %c0_86 = arith.constant 0 : index
    %c0_87 = arith.constant 0 : index
    %239 = vector.load %arg11[%c0_85, %c0_86, %c0_87] : memref<1x64x32xbf16, #tpu.memory_space<vmem>>, vector<1x64x32xbf16>
    %240 = vector.shape_cast %239 : vector<1x64x32xbf16> to vector<64x32xbf16>
    %cst_88 = arith.constant dense<0.000000e+00> : vector<16x32xf32>
    %241 = tpu.matmul %238, %240, %cst_88 {dimension_numbers = #tpu.dot_dimension_numbers<[1], [0], [0], [1], [0, 0, 1, 1], [], []>} : vector<16x64xbf16>, vector<64x32xbf16>, vector<16x32xf32> -> vector<16x32xf32>
    %c0_89 = arith.constant 0 : index
    %c0_90 = arith.constant 0 : index
    %c0_91 = arith.constant 0 : index
    %242 = vector.load %arg12[%c0_89, %c0_90, %c0_91] : memref<1x1x32xf32, #tpu.memory_space<vmem>>, vector<1x1x32xf32>
    %243 = vector.shape_cast %242 : vector<1x1x32xf32> to vector<1x32xf32>
    %244 = vector.broadcast %243 : vector<1x32xf32> to vector<16x32xf32>
    %245 = arith.addf %241, %244 : vector<16x32xf32>
    %246 = arith.addf %227, %245 : vector<16x32xf32>
    %cst_92 = arith.constant dense<0.000000e+00> : vector<16xf32>
    %247 = vector.multi_reduction <add>, %246, %cst_92 [1] : vector<16x32xf32> to vector<16xf32>
    %248 = vector.shape_cast %247 : vector<16xf32> to vector<16x1xf32>
    %cst_93 = arith.constant 3.200000e+01 : f32
    %249 = vector.broadcast %cst_93 : f32 to vector<16x1xf32>
    %250 = arith.divf %248, %249 : vector<16x1xf32>
    %251 = vector.broadcast %250 : vector<16x1xf32> to vector<16x32xf32>
    %252 = arith.subf %246, %251 : vector<16x32xf32>
    %253 = vector.broadcast %250 : vector<16x1xf32> to vector<16x32xf32>
    %254 = arith.subf %246, %253 : vector<16x32xf32>
    %255 = arith.mulf %252, %254 : vector<16x32xf32>
    %cst_94 = arith.constant dense<0.000000e+00> : vector<16xf32>
    %256 = vector.multi_reduction <add>, %255, %cst_94 [1] : vector<16x32xf32> to vector<16xf32>
    %257 = vector.shape_cast %256 : vector<16xf32> to vector<16x1xf32>
    %cst_95 = arith.constant 3.200000e+01 : f32
    %258 = vector.broadcast %cst_95 : f32 to vector<16x1xf32>
    %259 = arith.divf %257, %258 : vector<16x1xf32>
    %260 = vector.broadcast %250 : vector<16x1xf32> to vector<16x32xf32>
    %261 = arith.subf %246, %260 : vector<16x32xf32>
    %cst_96 = arith.constant 9.99999974E-6 : f32
    %262 = vector.broadcast %cst_96 : f32 to vector<16x1xf32>
    %263 = arith.addf %259, %262 : vector<16x1xf32>
    %264 = math.rsqrt %263 : vector<16x1xf32>
    %265 = vector.broadcast %264 : vector<16x1xf32> to vector<16x32xf32>
    %266 = arith.mulf %261, %265 : vector<16x32xf32>
    %c0_97 = arith.constant 0 : index
    %c0_98 = arith.constant 0 : index
    %c0_99 = arith.constant 0 : index
    %267 = vector.load %arg13[%c0_97, %c0_98, %c0_99] : memref<1x1x32xf32, #tpu.memory_space<vmem>>, vector<1x1x32xf32>
    %268 = vector.shape_cast %267 : vector<1x1x32xf32> to vector<1x32xf32>
    %269 = vector.broadcast %268 : vector<1x32xf32> to vector<16x32xf32>
    %270 = arith.mulf %266, %269 : vector<16x32xf32>
    %c0_100 = arith.constant 0 : index
    %c0_101 = arith.constant 0 : index
    %c0_102 = arith.constant 0 : index
    %271 = vector.load %arg14[%c0_100, %c0_101, %c0_102] : memref<1x1x32xf32, #tpu.memory_space<vmem>>, vector<1x1x32xf32>
    %272 = vector.shape_cast %271 : vector<1x1x32xf32> to vector<1x32xf32>
    %273 = vector.broadcast %272 : vector<1x32xf32> to vector<16x32xf32>
    %274 = arith.addf %270, %273 : vector<16x32xf32>
    %c0_103 = arith.constant 0 : index
    %c0_104 = arith.constant 0 : index
    %275 = vector.load %arg16[%c0_103, %c0_104] : memref<16x32xf32, #tpu.memory_space<vmem>>, vector<16x32xf32>
    tpu.vector_store %arg16[%c0_103, %c0_104], %274 {strides = array<i32>} : memref<16x32xf32, #tpu.memory_space<vmem>>, vector<16x32xf32>,
    %c1_i32 = arith.constant 1 : i32
    %276 = arith.cmpi eq, %arg0, %c1_i32 : i32
    %277 = arith.extui %276 : i1 to i32
    %c0_i32_105 = arith.constant 0 : i32
    %278 = arith.cmpi ne, %277, %c0_i32_105 : i32
    scf.if %278 {
      %c0_106 = arith.constant 0 : index
      %c0_107 = arith.constant 0 : index
      %279 = vector.load %arg16[%c0_106, %c0_107] : memref<16x32xf32, #tpu.memory_space<vmem>>, vector<16x32xf32>
      %c0_108 = arith.constant 0 : index
      %c0_109 = arith.constant 0 : index
      %280 = vector.load %arg15[%c0_108, %c0_109] : memref<16x32xf32, #tpu.memory_space<vmem>>, vector<16x32xf32>
      tpu.vector_store %arg15[%c0_108, %c0_109], %279 {strides = array<i32>} : memref<16x32xf32, #tpu.memory_space<vmem>>, vector<16x32xf32>,
    } else {
    }
    return
  }
  func.func @transform_0(%arg0: i32) -> (i32, i32) {
    %c0_i32 = arith.constant 0 : i32
    %c0_i32_0 = arith.constant 0 : i32
    %c0_i32_1 = arith.constant 0 : i32
    return %c0_i32, %c0_i32_0 : i32, i32
  }
  func.func @transform_1(%arg0: i32) -> (i32, i32) {
    %c0_i32 = arith.constant 0 : i32
    %c0_i32_0 = arith.constant 0 : i32
    %c0_i32_1 = arith.constant 0 : i32
    return %c0_i32, %c0_i32_0 : i32, i32
  }
  func.func @transform_2(%arg0: i32) -> (i32, i32, i32) {
    %c0_i32 = arith.constant 0 : i32
    %c0_i32_0 = arith.constant 0 : i32
    %c0_i32_1 = arith.constant 0 : i32
    return %arg0, %c0_i32, %c0_i32_0 : i32, i32, i32
  }
  func.func @transform_3(%arg0: i32) -> (i32, i32, i32) {
    %c0_i32 = arith.constant 0 : i32
    %c0_i32_0 = arith.constant 0 : i32
    %c0_i32_1 = arith.constant 0 : i32
    return %arg0, %c0_i32, %c0_i32_0 : i32, i32, i32
  }
  func.func @transform_4(%arg0: i32) -> (i32, i32, i32) {
    %c0_i32 = arith.constant 0 : i32
    %c0_i32_0 = arith.constant 0 : i32
    %c0_i32_1 = arith.constant 0 : i32
    return %arg0, %c0_i32, %c0_i32_0 : i32, i32, i32
  }
  func.func @transform_5(%arg0: i32) -> (i32, i32, i32) {
    %c0_i32 = arith.constant 0 : i32
    %c0_i32_0 = arith.constant 0 : i32
    %c0_i32_1 = arith.constant 0 : i32
    return %arg0, %c0_i32, %c0_i32_0 : i32, i32, i32
  }
  func.func @transform_6(%arg0: i32) -> (i32, i32, i32) {
    %c0_i32 = arith.constant 0 : i32
    %c0_i32_0 = arith.constant 0 : i32
    %c0_i32_1 = arith.constant 0 : i32
    return %arg0, %c0_i32, %c0_i32_0 : i32, i32, i32
  }
  func.func @transform_7(%arg0: i32) -> (i32, i32, i32) {
    %c0_i32 = arith.constant 0 : i32
    %c0_i32_0 = arith.constant 0 : i32
    %c0_i32_1 = arith.constant 0 : i32
    return %arg0, %c0_i32, %c0_i32_0 : i32, i32, i32
  }
  func.func @transform_8(%arg0: i32) -> (i32, i32, i32) {
    %c0_i32 = arith.constant 0 : i32
    %c0_i32_0 = arith.constant 0 : i32
    %c0_i32_1 = arith.constant 0 : i32
    return %arg0, %c0_i32, %c0_i32_0 : i32, i32, i32
  }
  func.func @transform_9(%arg0: i32) -> (i32, i32, i32) {
    %c0_i32 = arith.constant 0 : i32
    %c0_i32_0 = arith.constant 0 : i32
    %c0_i32_1 = arith.constant 0 : i32
    return %arg0, %c0_i32, %c0_i32_0 : i32, i32, i32
  }
  func.func @transform_10(%arg0: i32) -> (i32, i32, i32) {
    %c0_i32 = arith.constant 0 : i32
    %c0_i32_0 = arith.constant 0 : i32
    %c0_i32_1 = arith.constant 0 : i32
    return %arg0, %c0_i32, %c0_i32_0 : i32, i32, i32
  }
  func.func @transform_11(%arg0: i32) -> (i32, i32, i32) {
    %c0_i32 = arith.constant 0 : i32
    %c0_i32_0 = arith.constant 0 : i32
    %c0_i32_1 = arith.constant 0 : i32
    return %arg0, %c0_i32, %c0_i32_0 : i32, i32, i32
  }
  func.func @transform_12(%arg0: i32) -> (i32, i32, i32) {
    %c0_i32 = arith.constant 0 : i32
    %c0_i32_0 = arith.constant 0 : i32
    %c0_i32_1 = arith.constant 0 : i32
    return %arg0, %c0_i32, %c0_i32_0 : i32, i32, i32
  }
  func.func @transform_13(%arg0: i32) -> (i32, i32, i32) {
    %c0_i32 = arith.constant 0 : i32
    %c0_i32_0 = arith.constant 0 : i32
    %c0_i32_1 = arith.constant 0 : i32
    return %arg0, %c0_i32, %c0_i32_0 : i32, i32, i32
  }
  func.func @transform_14(%arg0: i32) -> (i32, i32) {
    %c0_i32 = arith.constant 0 : i32
    %c0_i32_0 = arith.constant 0 : i32
    %c0_i32_1 = arith.constant 0 : i32
    return %c0_i32, %c0_i32_0 : i32, i32
  }
}

</mosaic_0001>

<bundles_post_ra>
// kernel: tpu_custom_call.1
= control target key start
LH: loop header
LB: loop body
LE: loop exit
PB: predicated region body
PF: predicated region fallthrough
CT: control target
= control target key end

     0   :  { %s2815_s0 = inlined_call_operand.hbm [shape: f32[16,32], index: 0, kind: input, shape index: {}]   ;;  %s2816_s1 = inlined_call_operand.hbm [shape: f32[2,8], index: 1, kind: input, shape index: {}]   ;;  %s2817_s2 = inlined_call_operand.vmem [shape: bf16[2,32,96], index: 2, kind: input, shape index: {}]   ;;  %s2818_s3 = inlined_call_operand.hbm [shape: f32[2,1,96], index: 3, kind: input, shape index: {}]   ;;  %s2819_s4 = inlined_call_operand.vmem [shape: bf16[2,32,32], index: 4, kind: input, shape index: {}]   ;;  %s2820_s5 = inlined_call_operand.vmem [shape: f32[2,1,32], index: 5, kind: input, shape index: {}]   ;;  %s2821_s6 = inlined_call_operand.vmem [shape: f32[2,1,32], index: 6, kind: input, shape index: {}]   ;;  %s2822_s7 = inlined_call_operand.hbm [shape: f32[2,1,32], index: 7, kind: input, shape index: {}]   ;;  %s2823_s8 = inlined_call_operand.vmem [shape: bf16[2,32,64], index: 8, kind: input, shape index: {}]   ;;  %s2824_s9 = inlined_call_operand.vmem [shape: f32[2,1,64], index: 9, kind: input, shape index: {}]   ;;  %s2825_s10 = inlined_call_operand.vmem [shape: bf16[2,64,32], index: 10, kind: input, shape index: {}]   ;;  %s2826_s11 = inlined_call_operand.vmem [shape: f32[2,1,32], index: 11, kind: input, shape index: {}]   ;;  %s2827_s12 = inlined_call_operand.vmem [shape: f32[2,1,32], index: 12, kind: input, shape index: {}]   ;;  %s2828_s13 = inlined_call_operand.hbm [shape: f32[2,1,32], index: 13, kind: input, shape index: {}]   ;;  %s2829_s14 = inlined_call_operand.hbm [shape: f32[16,32], index: 14, kind: output, shape index: {}]  }
   0x1   :  { %2833 = sst [smem:[#allocation20_spill]] %s2815_s0 }
   0x2   :  { %2834 = sst [smem:[#allocation21_spill]] %s2816_s1 }
   0x3   :  { %2835 = sst [smem:[#allocation22_spill]] %s2817_s2 }
   0x4   :  { %2836 = sst [smem:[#allocation23_spill]] %s2818_s3 }
   0x5   :  { %2837 = sst [smem:[#allocation24_spill]] %s2819_s4 }
   0x6   :  { %2838 = sst [smem:[#allocation25_spill]] %s2824_s9 }
   0x7   :  { %2839 = sst [smem:[#allocation26_spill]] %s2825_s10 }
   0x8   :  { %2840 = sst [smem:[#allocation27_spill]] %s2826_s11 }
   0x9   :  { %2841 = sst [smem:[#allocation28_spill]] %s2827_s12 }
   0xa   :  { %2842 = sst [smem:[#allocation29_spill]] %s2829_s14 }
   0xb   :  { %19 = vsyncpa [#allocation5], 0 }
   0xc   :  { %20 = vsyncpa [#allocation8], 0 }
   0xd   :  { %21 = vsyncpa [#allocation6], 0  ;;  %s2390_s29 = smov 0   ;;  %s2392_s30 = smov 0  }
   0xe   :  { %s2394_s15 = smov 0   ;;  %s2396_s16 = smov 0  }
   0xf LB: > { %2843 = sst [smem:[#allocation17_spill]] %s2288_s15  ;;  %s2409_s17 = sadd.s32 4294967295, %s2292_s16   ;;  %s2292_s16 = sphi %s2396_s16, %s2867_s16   ;;  %s2288_s15 = sphi %s2394_s15, %s2869_s15   ;;  %s2284_s30 = sphi %s2392_s30, %s2871_s30   ;;  %s2280_s29 = sphi %s2390_s29, %s2870_s29  }
  0x10   : > { %p115_p0 = scmp.ne.s32.totalorder %s2284_s30, %s2280_s29  ;;  %p116_p1 = scmp.eq.s32.totalorder %s2409_s17, 0 }
  0x11   : > { %p1827_p2 = scmp.ge.s32.totalorder %s2292_s16, 1  ;;  %p407_p3 = scmp.lt.s32.totalorder %s2292_s16, 3 }
  0x12   : > { %p2418_p5 = por %p116_p1, %p115_p0  ;;  %s2845_s0 = sld [smem:[#allocation20_spill]] }
  0x13   : > { %p2425_p6 = pnand %p1827_p2, %p407_p3  ;;  %s2294_s23 = smov [#allocation4]  }
  0x14   : > { %s420_s24 = sshll.u32 %s2294_s23, 4  ;;  %s2438_s26 = sadd.s32 1, %s2292_s16   ;;  %s421_s24 = int_to_ptr.vmem [resolvable:$true] %s420_s24 }
  0x15   : > { %p1941_p7 = pneg %p2425_p6  ;;  %2848 = sst [smem:[#allocation18_spill]] %s2438_s26 }
  0x16   : > { %s2295_s27 = smov 128   ;;  %s2296_s28 = smov 8  }
  0x17   : > { %p2433_p8 = pnand %p1941_p7, %p116_p1  ;;  %s99_s29 = ssub.s32 %s2292_s16, %s2438_s26 }
  0x18   : > { %s418_s21 = sshll.u32 %s2845_s0, 4  ;;  %s102_s19 = sadd.s32 1, %s2288_s15  ;;  %s419_s21 = int_to_ptr.hbm [resolvable:$true] %s418_s21 }
  0x19   : > { %1944 = dma.hbm_to_vmem [thread:$0]  (!%p2433_p8), %s419_s21, 256, %s421_s24, [#allocation5], %s2295_s27, %s2295_s27, %s2296_s28  }
  0x1a   : > { %p100_p9 = scmp.eq.s32.totalorder %s99_s29, 0  ;;  %p109_p10 = scmp.ne.s32.totalorder %s2288_s15, %s2284_s30 }
  0x1b   : > { %p110_p11 = scmp.eq.s32.totalorder %s2292_s16, 0  ;;  %p1960_p12 = scmp.lt.s32.totalorder %s2292_s16, 2 }
  0x1c   : > { %s2450_s20 = scalar_select %p100_p9, %s2288_s15, %s102_s19  }
  0x1d   : > { %p111_p13 = por %p110_p11, %p109_p10  ;;  %s454_s23 = sand.u32 1, %s2292_s16  }
  0x1e   : > { %2849 = sst [smem:[#allocation19_spill]] %s2450_s20  ;;  %s2454_s0 = sand.u32 1, %s2288_s15  }
  0x1f   : > { %s2850_s3 = sld [smem:[#allocation23_spill]]  ;;  %s457_s24 = scalar_lea.vmem [#allocation9], %s2454_s0 }
  0x20   : > { %s464_s27 = sshll.u32 %s457_s24, 4  ;;  %p2461_p0 = pnand %p1960_p12, %p111_p13  ;;  %s465_s27 = int_to_ptr.vmem [resolvable:$true] %s464_s27 }
  0x21   : > { %s497_s20 = scalar_lea.hbm %s2822_s7, %s2292_s16  ;;  %s494_s15 = scalar_lea.vmem [#allocation10], %s2454_s0 }
  0x22   : > { %s2470_s12 = sshll.u32 %s494_s15, 4  ;;  %s2472_s14 = sshll.u32 %s497_s20, 4  ;;  %s500_s14 = int_to_ptr.hbm [resolvable:$true] %s2472_s14  ;;  %s502_s12 = int_to_ptr.vmem [resolvable:$true] %s2470_s12 }
  0x23   : > { %p2102_p3 = pneg %p2461_p0 }
  0x25   : > { %s460_s11 = scalar_lea.hbm %s2850_s3, %s2292_s16  ;;  %s2105_s10 = scalar_lea.hbm %s2850_s3, 2 }
  0x26   : > { %s462_s21 = sshll.u32 %s460_s11, 4  ;;  %s2474_s11 = scalar_lea.sflag [#allocation5], %s454_s23  ;;  %s463_s21 = int_to_ptr.hbm [resolvable:$true] %s462_s21 }
  0x27   : > { %s2098_s24 = sshra.s32 %s463_s21, 4  ;;  %s2099_s24 = int_to_ptr.hbm [resolvable:$true] %s2098_s24 }
  0x28   : > { %s2100_s26 = scalar_lea.hbm %s2099_s24, 1  ;;  %p2106_p10 = scmp.lt.s32.totalorder %s2099_s24, %s2850_s3 }
  0x29   : > { %p2101_p2 = scmp.ne.s32.totalorder %s2099_s24, %s2100_s26  ;;  %p2107_p11 = scmp.lt.s32.totalorder %s2105_s10, %s2100_s26 }
  0x2b   : > { %p2103_p7 = pnand %p2102_p3, %p2101_p2  ;;  %p2108_p12 = por %p2107_p11, %p2106_p10 }
  0x2d   : > { %p2104_p9 = pneg %p2103_p7 }
  0x2f   : > { %p2109_p13 = pnand %p2108_p12, %p2104_p9 }
  0x31   : > { %2112 = shalt.err (!%p2109_p13)
}
  0x32   : > { %1951 = dma.hbm_to_vmem [thread:$0]  (!%p2461_p0), %s463_s21, 16, %s465_s27, %s2474_s11  }
  0x33   : > { %s2128_s20 = sshra.s32 %s500_s14, 4  ;;  %s2135_s26 = scalar_lea.hbm %s2822_s7, 2  ;;  %s2129_s20 = int_to_ptr.hbm [resolvable:$true] %s2128_s20 }
  0x34   : > { %s2130_s23 = scalar_lea.hbm %s2129_s20, 1  ;;  %p2136_p9 = scmp.lt.s32.totalorder %s2129_s20, %s2822_s7 }
  0x35   : > { %p2131_p2 = scmp.ne.s32.totalorder %s2129_s20, %s2130_s23  ;;  %p2137_p10 = scmp.lt.s32.totalorder %s2135_s26, %s2130_s23 }
  0x37   : > { %p2133_p7 = pnand %p2131_p2, %p2102_p3  ;;  %p2138_p11 = por %p2137_p10, %p2136_p9 }
  0x39   : > { %p2134_p4 = pneg %p2133_p7 }
  0x3b   : > { %p2139_p12 = pnand %p2138_p11, %p2134_p4 }
  0x3d   : > { %2142 = shalt.err (!%p2139_p12)
}
  0x3e   : > { %1954 = dma.hbm_to_vmem [thread:$0]  (!%p2461_p0), %s500_s14, 16, %s502_s12, %s2474_s11  }
  0x3f   : > { %s2852_s1 = sld [smem:[#allocation21_spill]]  ;;  %s2297_s15 = smov [#allocation7]  }
  0x40   : > { %s435_s9 = sshll.u32 %s2297_s15, 4  ;;  %s548_s10 = scalar_lea.hbm %s2828_s13, %s2292_s16  ;;  %s436_s9 = int_to_ptr.vmem [resolvable:$true] %s435_s9 }
  0x41   : > { %s545_s26 = scalar_lea.vmem [#allocation11], %s2454_s0  ;;  %s550_s29 = sshll.u32 %s548_s10, 4  ;;  %s551_s29 = int_to_ptr.hbm [resolvable:$true] %s550_s29 }
  0x42   : > { %s552_s24 = sshll.u32 %s545_s26, 4  ;;  %s2188_s12 = sshra.s32 %s551_s29, 4  ;;  %s553_s24 = int_to_ptr.vmem [resolvable:$true] %s552_s24  ;;  %s2189_s12 = int_to_ptr.hbm [resolvable:$true] %s2188_s12 }
  0x43   : > { %s2190_s14 = scalar_lea.hbm %s2189_s12, 1  ;;  %s2195_s27 = scalar_lea.hbm %s2828_s13, 2 }
  0x44   : > { %p2191_p4 = scmp.ne.s32.totalorder %s2189_s12, %s2190_s14  ;;  %p2197_p7 = scmp.lt.s32.totalorder %s2195_s27, %s2190_s14 }
  0x45   : > { %s433_s19 = sshll.u32 %s2852_s1, 4  ;;  %s434_s19 = int_to_ptr.hbm [resolvable:$true] %s433_s19 }
  0x46   : > { %1947 = dma.hbm_to_vmem [thread:$0]  (!%p2433_p8), %s434_s19, 32, %s436_s9, [#allocation8]  }
  0x47   : > { %p2193_p13 = pnand %p2191_p4, %p2102_p3  ;;  %p2196_p8 = scmp.lt.s32.totalorder %s2189_s12, %s2828_s13 }
  0x49   : > { %p2194_p2 = pneg %p2193_p13  ;;  %p2198_p9 = por %p2197_p7, %p2196_p8 }
  0x4b   : > { %p2199_p10 = pnand %p2198_p9, %p2194_p2 }
  0x4d   : > { %2202 = shalt.err (!%p2199_p10)
}
  0x4e   : > { %1957 = dma.hbm_to_vmem [thread:$0]  (!%p2461_p0), %s551_s29, 16, %s553_s24, %s2474_s11  }
  0x4f   : > { %561 = sbr.rel (%p2425_p6) target bundleno = 2102 (0x836), region = 76 }
  0x54   : > { %2263 = dma.done.wait (%p116_p1), [#allocation5], 256  }
  0x55   : > { %2265 = vsyncadd (%p116_p1), [#allocation5], 4294967040 }
  0x56   : > { %2267 = dma.done.wait (%p116_p1), [#allocation8], 32  }
  0x57   : > { %2269 = vsyncadd (%p116_p1), [#allocation8], 4294967264  ;;  %s573_s0 = sand.u32 1, %s2409_s17   ;;  %s2538_s16 = sand.u32 1, %s2284_s30  }
  0x58   : > { %s574_s22 = scalar_lea.sflag [#allocation5], %s573_s0 }
  0x59   : > { %2271 = dma.done.wait (%p2418_p5), %s574_s22, 48  }
  0x5a   : > { %2273 = vsyncadd (%p2418_p5), %s574_s22, 4294967248  ;;  %p677_p6 = scmp.lt.s32.totalorder %s2409_s17, 1  ;;  %s2853_s2 = sld [smem:[#allocation22_spill]] }
  0x5b   : > { %s2854_s4 = sld [smem:[#allocation24_spill]]  ;;  %s594_s15 = scalar_lea.vmem [#allocation11], %s2538_s16 }
  0x5c   : > { %s2547_s11 = scalar_select %p677_p6, %s2409_s17, 1 }
  0x5d   : > { %s2855_s23 = sld [smem:[#allocation25_spill]]  ;;  %p2859_p1 = scmp.ne.s32.totalorder %s2409_s17, 0 }
  0x5e   : > { %s1909_s9 = sshll.u32 %s2547_s11, 4  ;;  %s1912_s10 = sshll.u32 %s2547_s11, 5 }
  0x5f   : > { %s2569_s0 = scalar_lea.vmem %s2823_s8, %s1909_s9  ;;  %s2856_s1 = sld [smem:[#allocation26_spill]] }
  0x60   : > { %s681_s24 = scalar_lea.vmem %s2853_s2, %s1909_s9  ;;  %s2857_s3 = sld [smem:[#allocation27_spill]] }
  0x61   : > { %s2560_s14 = scalar_lea.vmem %s2854_s4, %s1909_s9  ;;  %s2858_s4 = sld [smem:[#allocation28_spill]] }
  0x62   : > { %s585_s9 = scalar_lea.vmem [#allocation10], %s2538_s16 }
  0x63   : > { %s700_s18 = scalar_lea.vmem %s2855_s23, %s2547_s11  ;;  %716 = sbr.rel (%p2859_p1) target bundleno = 107 (0x6b), region = 100 }
  0x65   : > { %s2579_s29 = scalar_lea.vmem %s2856_s1, %s1912_s10 }
  0x66   : > { %s708_s21 = scalar_lea.vmem %s2857_s3, %s2547_s11 }
  0x67   : > { %s711_s19 = scalar_lea.vmem %s2858_s4, %s2547_s11 }
  0x68   : > { %v717_v0 = vld [vmem:[#allocation4] sm:$0xff]  ;;  %vm719_vm0 = vcmask 261120   ;;  %v718_v1 = vld [vmem:[#allocation4 + $0x8] sm:$0xff] }
  0x69   : > { %720 = vst.msk [vmem:[#allocation2] sm:$0xff] %vm719_vm0, %v717_v0 }
  0x6a   : > { %721 = vst.msk [vmem:[#allocation2 + $0x8] sm:$0xff] %vm719_vm0, %v718_v1 }
  0x6b PF: > { %v1914_v2 = vld [vmem:[%s681_s24 + $0x8] sm:$0xff]  ;;  %v1913_v3 = vld [vmem:[%s681_s24] sm:$0xff]  ;;  %vm748_vm1 = vcmask 261120   ;;  %s2860_s1 = scalar_lea.vmem [#allocation9], %s2538_s16  ;;  %s2298_s2 = smov 104   ;;  %vm771_vm2 = vcmask 64512  }
  0x6c   : > { %758 = vmatpush.bf16.msra.mxu0 %v1914_v2  ;;  %v2018_v7 = vld [vmem:[%s2860_s1] ss:$0 sm:$0xff]  ;;  %s2299_s3 = smov 120   ;;  %s2300_s4 = smov 96   ;;  %v724_v36 = vld [vmem:[#allocation7] sm:$0x3] }
  0x6d   : > { %s2301_s28 = smov 80   ;;  %s2302_s24 = smov 72   ;;  %v1843_v37 = vadd.f32 -1.0, %v724_v36  ;;  %vm821_vm3 = vcmask 1043456  }
  0x6e   : > { %s2303_s27 = smov 88   ;;  %s2304_s22 = smov 112  }
  0x6f   : > { %v726_v38 = vmul.f32 1e+09, %v1843_v37  ;;  %s2305_s20 = smov 64   ;;  %s2306_s23 = smov 56  }
  0x70   : > { %v2593_v4 = vld [vmem:[#allocation2] sm:$0xff]  ;;  %759 = vmatpush.bf16.msra.mxu0 %v1913_v3  ;;  %s2307_s10 = smov 40   ;;  %s2308_s26 = smov 48  }
  0x71   : > { %v2595_v5 = vld [vmem:[#allocation2 + $0x8] sm:$0xff]  ;;  %v767_v39 = vperm.slane %v726_v38, 0  ;;  %v1065_v51 = vperm.slane %v726_v38, 1  ;;  %s2309_s12 = smov 16   ;;  %s2310_s25 = smov 8  }
  0x72   : > { %v727_v6 = vpack.c.bf16 %v2595_v5, %v2593_v4  ;;  %s2311_s1 = smov 24   ;;  %p1904_p5 = scmp.ne.s32.totalorder %s2409_s17, 1 }
  0x74   : > { %1852 = vmatmul.msk.bf16.vlgmr.msra.gmra.mxu0 %vm748_vm1, %v727_v6 }
  0xf1   : > { %v761_v8 = vpop.f32.mrf.mxu0 }
  0xf2   : > { %v762_v9 = vadd.f32 %v2018_v7, %v761_v8 }
  0xf4   : > { %v2602_v10 = vpack.c.bf16 %v762_v9, %v762_v9 }
  0xf6   : > { %989 = vrot.lane.b32.xlu2 %v2602_v10, %s2298_s2  ;;  %839 = vrot.lane.b32.xlu1 %v2602_v10, %s2299_s3 }
  0xf7   : > { %769 = vrot.lane.b32.xlu0 %v2602_v10, %s2300_s4 }
  0xf9   : > { %v763_v11 = vpop.f32.mrf.mxu0 }
  0xfa   : > { %v764_v12 = vadd.f32 %v2018_v7, %v763_v11 }
  0xfc   : > { %v2610_v13 = vpack.c.bf16 %v764_v12, %v764_v12 }
  0xfe   : > { %916 = vrot.lane.b32.xlu2 %v2602_v10, %s2301_s28  ;;  %991 = vrot.lane.b32.xlu1 %v2602_v10, %s2302_s24 }
  0xff   : > { %841 = vrot.lane.b32.xlu0 %v2602_v10, %s2303_s27 }
 0x106   : > { %1135 = vrot.lane.b32.xlu2 %v2610_v13, %s2299_s3  ;;  %914 = vrot.lane.b32.xlu1 %v2602_v10, %s2304_s22 }
 0x107   : > { %1137 = vrot.lane.b32.xlu0 %v2610_v13, %s2303_s27 }
 0x10e   : > { %1283 = vrot.lane.b32.xlu2 %v2610_v13, %s2298_s2  ;;  %1285 = vrot.lane.b32.xlu1 %v2610_v13, %s2302_s24 }
 0x10f   : > { %1067 = vrot.lane.b32.xlu0 %v2610_v13, %s2300_s4  ;;  %s2861_s4 = scalar_lea.vmem %s2820_s5, %s2547_s11 }
 0x116   : > { %1209 = vrot.lane.b32.xlu1 %v2610_v13, %s2304_s22 }
 0x117   : > { %1211 = vrot.lane.b32.xlu0 %v2610_v13, %s2301_s28  ;;  %s2862_s28 = scalar_lea.vmem %s2821_s6, %s2547_s11 }
 0x150   : > { %v990_v14 = vpop.permute.xlu2 %989 }
 0x158   : > { %v917_v15 = vpop.permute.xlu2 %916 }
 0x159   : > { %v922_v16 = vsel %vm771_vm2, %v917_v15, 0 }
 0x15a   : > { %931 = vmatpush.bf16.xpose.msrb.mxu0 %v922_v16 }
 0x160   : > { %v1136_v33 = vpop.permute.xlu2 %1135 }
 0x168   : > { %v840_v17 = vpop.permute.xlu1 %839  ;;  %v1284_v35 = vpop.permute.xlu2 %1283 }
 0x169   : > { %v770_v18 = vpop.permute.xlu0 %769 }
 0x16a   : > { %v776_v19 = vsel %vm771_vm2, %v770_v18, 0 }
 0x16b   : > { %785 = vmatpush.bf16.xpose.msra.mxu1 %v776_v19 }
 0x170   : > { %v992_v20 = vpop.permute.xlu1 %991 }
 0x171   : > { %v842_v21 = vpop.permute.xlu0 %841  ;;  %v997_v22 = vsel %vm771_vm2, %v992_v20, 0 }
 0x172   : > { %1853 = vmatmul.msk.bf16.vlgmr.msra.gmra.mxu1 %vm771_vm2, %v2602_v10  ;;  %v847_v23 = vsel %vm771_vm2, %v842_v21, 0 }
 0x173   : > { %856 = vmatpush.bf16.xpose.msra.mxu3 %v847_v23 }
 0x178   : > { %v915_v24 = vpop.permute.xlu1 %914 }
 0x179   : > { %v1138_v25 = vpop.permute.xlu0 %1137  ;;  %1857 = vmatmul.msk.bf16.vlgmr.msrb.gmra.mxu0 %vm771_vm2, %v915_v24 }
 0x17a   : > { %v1143_v26 = vsel %vm771_vm2, %v1138_v25, 0  ;;  %1855 = vmatmul.msk.bf16.vlgmr.msra.gmra.mxu3 %vm771_vm2, %v840_v17 }
 0x17b   : > { %1006 = vmatpush.bf16.xpose.msrb.mxu3 %v997_v22 }
 0x180   : > { %v1286_v29 = vpop.permute.xlu1 %1285 }
 0x181   : > { %v1068_v27 = vpop.permute.xlu0 %1067  ;;  %v1291_v31 = vsel %vm771_vm2, %v1286_v29, 0 }
 0x182   : > { %v1073_v28 = vsel %vm771_vm2, %v1068_v27, 0 }
 0x183   : > { %1152 = vmatpush.bf16.xpose.msra.mxu3 %v1143_v26  ;;  %1082 = vmatpush.bf16.xpose.msra.mxu0 %v1073_v28 }
 0x188   : > { %v1210_v34 = vpop.permute.xlu1 %1209 }
 0x189   : > { %v1212_v30 = vpop.permute.xlu0 %1211 }
 0x18a   : > { %v1217_v32 = vsel %vm771_vm2, %v1212_v30, 0  ;;  %1859 = vmatmul.msk.bf16.vlgmr.msrb.gmra.mxu3 %vm771_vm2, %v990_v14  ;;  %1861 = vmatmul.msk.bf16.vlgmr.msra.gmra.mxu0 %vm771_vm2, %v2610_v13 }
 0x18b   : > { %1300 = vmatpush.bf16.xpose.msrb.mxu3 %v1291_v31  ;;  %1226 = vmatpush.bf16.xpose.msrb.mxu0 %v1217_v32 }
 0x19a   : > { %1863 = vmatmul.msk.bf16.vlgmr.msra.gmra.mxu3 %vm771_vm2, %v1136_v33  ;;  %1865 = vmatmul.msk.bf16.vlgmr.msrb.gmra.mxu0 %vm771_vm2, %v1210_v34 }
 0x1aa   : > { %1867 = vmatmul.msk.bf16.vlgmr.msrb.gmra.mxu3 %vm771_vm2, %v1284_v35 }
 0x1ef   : > { %v787_v40 = vpop.f32.mrf.mxu1 }
 0x1f0   : > { %v788_v41 = vadd.f32 %v787_v40, %v767_v39 }
 0x1f2   : > { %v791_v42 = vsel %vm771_vm2, %v788_v41, -inf }
 0x1f3   : > { %792 = vmax.xlane.f32.xlu2 %v791_v42 }
 0x1f6   : > { %v933_v43 = vpop.f32.mrf.mxu0 }
 0x1f7   : > { %v789_v44 = vpop.f32.mrf.mxu1  ;;  %v934_v45 = vadd.f32 %v933_v43, %v767_v39 }
 0x1f9   : > { %v937_v46 = vsel %vm771_vm2, %v934_v45, -inf }
 0x1fb   : > { %938 = vmax.xlane.f32.xlu2 %v937_v46 }
 0x1fd   : > { %v858_v47 = vpop.f32.mrf.mxu3 }
 0x1fe   : > { %v859_v48 = vadd.f32 %v858_v47, %v767_v39  ;;  %v935_v49 = vpop.f32.mrf.mxu0 }
 0x200   : > { %v862_v50 = vsel %vm771_vm2, %v859_v48, -inf }
 0x201   : > { %863 = vmax.xlane.f32.xlu0 %v862_v50 }
 0x205   : > { %v860_v52 = vpop.f32.mrf.mxu3 }
 0x207   : > { %v1084_v53 = vpop.f32.mrf.mxu0 }
 0x208   : > { %v1085_v54 = vadd.f32 %v1084_v53, %v1065_v51 }
 0x20a   : > { %v1088_v55 = vsel %vm771_vm2, %v1085_v54, -inf }
 0x20b   : > { %1089 = vmax.xlane.f32.xlu1 %v1088_v55 }
 0x20d   : > { %v1008_v56 = vpop.f32.mrf.mxu3 }
 0x20e   : > { %v1009_v57 = vadd.f32 %v1008_v56, %v767_v39 }
 0x20f   : > { %v1086_v58 = vpop.f32.mrf.mxu0 }
 0x210   : > { %v1012_v59 = vsel %vm771_vm2, %v1009_v57, -inf }
 0x213   : > { %816 = vrot.lane.b32.xlu2 %v2602_v10, %s2305_s20  ;;  %1013 = vmax.xlane.f32.xlu1 %v1012_v59 }
 0x215   : > { %v1010_v60 = vpop.f32.mrf.mxu3 }
 0x217   : > { %v1228_v61 = vpop.f32.mrf.mxu0 }
 0x218   : > { %v2649_v9 = vadd.f32 %v1228_v61, %v1065_v51 }
 0x21a   : > { %v1232_v11 = vsel %vm771_vm2, %v2649_v9, -inf }
 0x21d   : > { %v1154_v62 = vpop.f32.mrf.mxu3 }
 0x21e   : > { %v1155_v3 = vadd.f32 %v1154_v62, %v1065_v51 }
 0x21f   : > { %v1230_v63 = vpop.f32.mrf.mxu0 }
 0x220   : > { %v1158_v6 = vsel %vm771_vm2, %v1155_v3, -inf }
 0x225   : > { %v1156_v0 = vpop.f32.mrf.mxu3 }
 0x22c   : > { %887 = vrot.lane.b32.xlu1 %v2602_v10, %s2306_s23 }
 0x22d   : > { %v1302_v1 = vpop.f32.mrf.mxu3 }
 0x22e   : > { %v1303_v7 = vadd.f32 %v1302_v1, %v1065_v51 }
 0x230   : > { %v1306_v8 = vsel %vm771_vm2, %v1303_v7, -inf }
 0x235   : > { %v1304_v2 = vpop.f32.mrf.mxu3 }
 0x23c   : > { %1159 = vmax.xlane.f32.xlu2 %v1158_v6 }
 0x244   : > { %1307 = vmax.xlane.f32.xlu2 %v1306_v8 }
 0x256   : > { %1233 = vmax.xlane.f32.xlu1 %v1232_v11 }
 0x25c   : > { %1037 = vrot.lane.b32.xlu2 %v2602_v10, %s2307_s10 }
 0x266   : > { %v793_v12 = vpop.xlane.xlu2 %792 }
 0x267   : > { %v794_v14 = vsub.f32 %v788_v41, %v793_v12 }
 0x269   : > { %v795_v15 = vmul.f32 1.442695, %v794_v14 }
 0x26b   : > { %2026 = vpow2.f32 %v795_v15 }
 0x26e   : > { %v939_v16 = vpop.xlane.xlu2 %938 }
 0x26f   : > { %v940_v17 = vsub.f32 %v934_v45, %v939_v16  ;;  %962 = vrot.lane.b32.xlu1 %v2602_v10, %s2308_s26 }
 0x271   : > { %v2657_v18 = vpop.eup %2026  ;;  %v941_v19 = vmul.f32 1.442695, %v940_v17 }
 0x272   : > { %v797_v20 = vsel %vm771_vm2, %v2657_v18, 0.0 }
 0x273   : > { %2028 = vpow2.f32 %v941_v19  ;;  %798 = vadd.xlane.f32.xlu0 %v797_v20 }
 0x274   : > { %v864_v21 = vpop.xlane.xlu0 %863 }
 0x275   : > { %v865_v22 = vsub.f32 %v859_v48, %v864_v21 }
 0x276   : > { %v817_v23 = vpop.permute.xlu2 %816 }
 0x277   : > { %v866_v24 = vmul.f32 1.442695, %v865_v22  ;;  %v823_v25 = vsel %vm821_vm3, %v817_v23, 0 }
 0x278   : > { %832 = vmatpush.bf16.msra.mxu2 %v823_v25 }
 0x279   : > { %v2662_v26 = vpop.eup %2028  ;;  %2030 = vpow2.f32 %v866_v24 }
 0x27a   : > { %v943_v10 = vsel %vm771_vm2, %v2662_v26, 0.0 }
 0x27b   : > { %944 = vadd.xlane.f32.xlu0 %v943_v10 }
 0x27e   : > { %v1090_v27 = vpop.xlane.xlu1 %1089 }
 0x27f   : > { %v2666_v28 = vpop.eup %2030  ;;  %v1091_v29 = vsub.f32 %v1085_v54, %v1090_v27 }
 0x280   : > { %v868_v31 = vsel %vm771_vm2, %v2666_v28, 0.0 }
 0x281   : > { %v1092_v30 = vmul.f32 1.442695, %v1091_v29 }
 0x283   : > { %2032 = vpow2.f32 %v1092_v30  ;;  %869 = vadd.xlane.f32.xlu0 %v868_v31 }
 0x286   : > { %v1014_v32 = vpop.xlane.xlu1 %1013 }
 0x287   : > { %v1015_v33 = vsub.f32 %v1009_v57, %v1014_v32 }
 0x289   : > { %v2670_v34 = vpop.eup %2032  ;;  %v1016_v35 = vmul.f32 1.442695, %v1015_v33 }
 0x28a   : > { %v1094_v36 = vsel %vm771_vm2, %v2670_v34, 0.0 }
 0x28b   : > { %2034 = vpow2.f32 %v1016_v35  ;;  %1095 = vadd.xlane.f32.xlu0 %v1094_v36 }
 0x291   : > { %v2674_v37 = vpop.eup %2034 }
 0x292   : > { %v1018_v38 = vsel %vm771_vm2, %v2674_v37, 0.0 }
 0x293   : > { %1019 = vadd.xlane.f32.xlu0 %v1018_v38 }
 0x29e   : > { %v888_v39 = vpop.permute.xlu1 %887 }
 0x29f   : > { %v893_v40 = vsel %vm821_vm3, %v888_v39, 0 }
 0x2a0   : > { %902 = vmatpush.bf16.msrb.mxu2 %v893_v40 }
 0x2af   : > { %v1160_v41 = vpop.xlane.xlu2 %1159 }
 0x2b0   : > { %v1161_v42 = vsub.f32 %v1155_v3, %v1160_v41 }
 0x2b2   : > { %v1162_v43 = vmul.f32 1.442695, %v1161_v42 }
 0x2b4   : > { %2036 = vpow2.f32 %v1162_v43 }
 0x2b7   : > { %v1308_v44 = vpop.xlane.xlu2 %1307 }
 0x2b8   : > { %v1309_v45 = vsub.f32 %v1303_v7, %v1308_v44 }
 0x2ba   : > { %v2679_v46 = vpop.eup %2036  ;;  %v1310_v47 = vmul.f32 1.442695, %v1309_v45 }
 0x2bb   : > { %v1164_v48 = vsel %vm771_vm2, %v2679_v46, 0.0 }
 0x2bc   : > { %2038 = vpow2.f32 %v1310_v47  ;;  %1165 = vadd.xlane.f32.xlu0 %v1164_v48 }
 0x2bf   : > { %v1038_v14 = vpop.permute.xlu2 %1037 }
 0x2c0   : > { %v1043_v22 = vsel %vm821_vm3, %v1038_v14, 0 }
 0x2c2   : > { %v2683_v49 = vpop.eup %2038 }
 0x2c3   : > { %v1312_v50 = vsel %vm771_vm2, %v2683_v49, 0.0 }
 0x2c4   : > { %1313 = vadd.xlane.f32.xlu2 %v1312_v50 }
 0x2c9   : > { %v1234_v51 = vpop.xlane.xlu1 %1233 }
 0x2ca   : > { %v1235_v52 = vsub.f32 %v2649_v9, %v1234_v51 }
 0x2cc   : > { %v1236_v53 = vmul.f32 1.442695, %v1235_v52 }
 0x2ce   : > { %2040 = vpow2.f32 %v1236_v53 }
 0x2d0   : > { %1183 = vrot.lane.b32.xlu0 %v2610_v13, %s2306_s23 }
 0x2d4   : > { %v2690_v54 = vpop.eup %2040 }
 0x2d5   : > { %v1238_v55 = vsel %vm771_vm2, %v2690_v54, 0.0 }
 0x2d6   : > { %1239 = vadd.xlane.f32.xlu1 %v1238_v55 }
 0x2d8   : > { %1113 = vrot.lane.b32.xlu0 %v2610_v13, %s2305_s20 }
 0x2e0   : > { %1331 = vrot.lane.b32.xlu0 %v2610_v13, %s2307_s10 }
 0x2e1   : > { %v963_v56 = vpop.permute.xlu1 %962 }
 0x2e2   : > { %v968_v57 = vsel %vm821_vm3, %v963_v56, 0 }
 0x2e3   : > { %977 = vmatpush.bf16.msrb.mxu1 %v968_v57 }
 0x2e6   : > { %v799_v58 = vpop.xlane.xlu0 %798 }
 0x2e7   : > { %2042 = vrcp.f32 %v799_v58  ;;  %v811_v0 = vand.u32 2147483648, %v799_v58  ;;  %v809_v1 = vand.u32 2147483647, %v799_v58  ;;  %vm805_vm5 = vweird.f32 %v799_v58 }
 0x2e8   : > { %1257 = vrot.lane.b32.xlu0 %v2610_v13, %s2308_s26 }
 0x2e9   : > { %v812_v6 = vor.u32 1.1754944e-38, %v811_v0  ;;  %vm810_vm7 = vcmp.eq.f32.partialorder %v809_v1, 8.507059e+37 }
 0x2ed   : > { %v2043_v59 = vpop.eup %2042 }
 0x2ee   : > { %v801_v60 = vmul.f32 %v2043_v59, %v799_v58  ;;  %v945_v61 = vpop.xlane.xlu0 %944  ;;  %vm806_vm4 = vweird.f32 %v2043_v59 }
 0x2ef   : > { %2044 = vrcp.f32 %v945_v61  ;;  %vm807_vm6 = vmor %vm805_vm5, %vm806_vm4  ;;  %v957_v16 = vand.u32 2147483648, %v945_v61  ;;  %v955_v17 = vand.u32 2147483647, %v945_v61  ;;  %vm951_vm9 = vweird.f32 %v945_v61 }
 0x2f0   : > { %v802_v62 = vsub.f32 1.0, %v801_v60 }
 0x2f1   : > { %v958_v23 = vor.u32 1.1754944e-38, %v957_v16  ;;  %vm956_vm11 = vcmp.eq.f32.partialorder %v955_v17, 8.507059e+37 }
 0x2f2   : > { %v803_v63 = vmul.f32 %v2043_v59, %v802_v62 }
 0x2f4   : > { %v804_v2 = vadd.f32 %v2043_v59, %v803_v63 }
 0x2f5   : > { %v2045_v3 = vpop.eup %2044 }
 0x2f6   : > { %v947_v7 = vmul.f32 %v2045_v3, %v945_v61  ;;  %v870_v8 = vpop.xlane.xlu0 %869  ;;  %v808_v9 = vsel %vm807_vm6, %v2043_v59, %v804_v2  ;;  %vm952_vm8 = vweird.f32 %v2045_v3 }
 0x2f7   : > { %2046 = vrcp.f32 %v870_v8  ;;  %v813_v11 = vsel %vm810_vm7, %v812_v6, %v808_v9  ;;  %vm953_vm10 = vmor %vm951_vm9, %vm952_vm8  ;;  %v882_v31 = vand.u32 2147483648, %v870_v8  ;;  %v880_v32 = vand.u32 2147483647, %v870_v8 }
 0x2f8   : > { %v948_v13 = vsub.f32 1.0, %v947_v7  ;;  %v814_v12 = vmul.f32 %v2657_v18, %v813_v11  ;;  %vm876_vm13 = vweird.f32 %v870_v8 }
 0x2f9   : > { %v883_v36 = vor.u32 1.1754944e-38, %v882_v31  ;;  %vm881_vm15 = vcmp.eq.f32.partialorder %v880_v32, 8.507059e+37 }
 0x2fa   : > { %v949_v15 = vmul.f32 %v2045_v3, %v948_v13  ;;  %v815_v19 = vpack.c.bf16 %v814_v12, %v814_v12 }
 0x2fc   : > { %v950_v20 = vadd.f32 %v2045_v3, %v949_v15  ;;  %1854 = vmatmul.msk.bf16.vlgmr.msra.gmra.mxu2 %vm771_vm2, %v815_v19 }
 0x2fd   : > { %v2047_v21 = vpop.eup %2046  ;;  %1052 = vmatpush.bf16.msra.mxu2 %v1043_v22 }
 0x2fe   : > { %v872_v24 = vmul.f32 %v2047_v21, %v870_v8  ;;  %v2704_v25 = vpop.xlane.xlu0 %1095  ;;  %v954_v18 = vsel %vm953_vm10, %v2045_v3, %v950_v20  ;;  %vm877_vm12 = vweird.f32 %v2047_v21 }
 0x2ff   : > { %v959_v27 = vsel %vm956_vm11, %v958_v23, %v954_v18  ;;  %vm878_vm14 = vmor %vm876_vm13, %vm877_vm12  ;;  %v1108_v11 = vand.u32 2147483648, %v2704_v25  ;;  %vm1102_vm12 = vweird.f32 %v2704_v25  ;;  %v1106_v14 = vand.u32 2147483647, %v2704_v25 }
 0x300   : > { %v873_v10 = vsub.f32 1.0, %v872_v24  ;;  %v960_v29 = vmul.f32 %v2662_v26, %v959_v27 }
 0x301   : > { %v1109_v22 = vor.u32 1.1754944e-38, %v1108_v11 }
 0x302   : > { %v874_v30 = vmul.f32 %v2047_v21, %v873_v10  ;;  %v961_v33 = vpack.c.bf16 %v960_v29, %v960_v29 }
 0x304   : > { %v875_v35 = vadd.f32 %v2047_v21, %v874_v30  ;;  %1858 = vmatmul.msk.bf16.vlgmr.msrb.gmra.mxu1 %vm771_vm2, %v961_v33 }
 0x306   : > { %v1020_v38 = vpop.xlane.xlu0 %1019  ;;  %v879_v39 = vsel %vm878_vm14, %v2047_v21, %v875_v35  ;;  %vm1107_vm14 = vcmp.eq.f32.partialorder %v1106_v14, 8.507059e+37 }
 0x307   : > { %2048 = vrcp.f32 %v1020_v38  ;;  %v884_v40 = vsel %vm881_vm15, %v883_v36, %v879_v39  ;;  %v1032_v45 = vand.u32 2147483648, %v1020_v38  ;;  %v1030_v48 = vand.u32 2147483647, %v1020_v38 }
 0x308   : > { %v885_v41 = vmul.f32 %v2666_v28, %v884_v40  ;;  %vm1026_vm4 = vweird.f32 %v1020_v38  ;;  %2050 = vrcp.f32 %v2704_v25 }
 0x309   : > { %v1033_v51 = vor.u32 1.1754944e-38, %v1032_v45  ;;  %vm1031_vm6 = vcmp.eq.f32.partialorder %v1030_v48, 8.507059e+37 }
 0x30a   : > { %v886_v42 = vpack.c.bf16 %v885_v41, %v885_v41 }
 0x30c   : > { %1856 = vmatmul.msk.bf16.vlgmr.msrb.gmra.mxu2 %vm771_vm2, %v886_v42 }
 0x30d   : > { %v2049_v26 = vpop.eup %2048 }
 0x30e   : > { %v1022_v43 = vmul.f32 %v2049_v26, %v1020_v38  ;;  %vm1027_vm0 = vweird.f32 %v2049_v26  ;;  %v2051_v57 = vpop.eup %2050 }
 0x30f   : > { %vm1028_vm5 = vmor %vm1026_vm4, %vm1027_vm0  ;;  %v1098_v58 = vmul.f32 %v2051_v57, %v2704_v25  ;;  %vm1103_vm9 = vweird.f32 %v2051_v57 }
 0x310   : > { %v1023_v44 = vsub.f32 1.0, %v1022_v43  ;;  %vm1104_vm13 = vmor %vm1102_vm12, %vm1103_vm9 }
 0x311   : > { %v1099_v60 = vsub.f32 1.0, %v1098_v58 }
 0x312   : > { %v1024_v47 = vmul.f32 %v2049_v26, %v1023_v44 }
 0x313   : > { %v1100_v1 = vmul.f32 %v2051_v57, %v1099_v60 }
 0x314   : > { %v1025_v50 = vadd.f32 %v2049_v26, %v1024_v47 }
 0x315   : > { %v1101_v8 = vadd.f32 %v2051_v57, %v1100_v1 }
 0x316   : > { %v1029_v52 = vsel %vm1028_vm5, %v2049_v26, %v1025_v50 }
 0x317   : > { %v1034_v53 = vsel %vm1031_vm6, %v1033_v51, %v1029_v52  ;;  %v1105_v19 = vsel %vm1104_vm13, %v2051_v57, %v1101_v8  ;;  %v1916_v8 = vld [vmem:[%s2560_s14 + $0x8] sm:$0xff] }
 0x318   : > { %v1035_v55 = vmul.f32 %v2674_v37, %v1034_v53  ;;  %v1110_v24 = vsel %vm1107_vm14, %v1109_v22, %v1105_v19  ;;  %1389 = vmatpush.bf16.msra.mxu0 %v1916_v8  ;;  %v2019_v19 = vld [vmem:[%s2861_s4] ss:$0 sm:$0xff] }
 0x319   : > { %v1111_v25 = vmul.f32 %v2670_v34, %v1110_v24 }
 0x31a   : > { %v1036_v28 = vpack.c.bf16 %v1035_v55, %v1035_v55 }
 0x31b   : > { %v1112_v33 = vpack.c.bf16 %v1111_v25, %v1111_v25 }
 0x31c   : > { %1860 = vmatmul.msk.bf16.vlgmr.msra.gmra.mxu2 %vm771_vm2, %v1036_v28 }
 0x32f   : > { %v1166_v56 = vpop.xlane.xlu0 %1165 }
 0x330   : > { %2052 = vrcp.f32 %v1166_v56  ;;  %v1178_v0 = vand.u32 2147483648, %v1166_v56  ;;  %v1176_v37 = vand.u32 2147483647, %v1166_v56  ;;  %vm1172_vm8 = vweird.f32 %v1166_v56 }
 0x332   : > { %v1179_v7 = vor.u32 1.1754944e-38, %v1178_v0  ;;  %vm1177_vm11 = vcmp.eq.f32.partialorder %v1176_v37, 8.507059e+37 }
 0x336   : > { %v2053_v59 = vpop.eup %2052 }
 0x337   : > { %v1168_v61 = vmul.f32 %v2053_v59, %v1166_v56  ;;  %v1314_v62 = vpop.xlane.xlu2 %1313  ;;  %vm1173_vm7 = vweird.f32 %v2053_v59 }
 0x338   : > { %2054 = vrcp.f32 %v1314_v62  ;;  %vm1174_vm10 = vmor %vm1172_vm8, %vm1173_vm7  ;;  %v1326_v10 = vand.u32 2147483648, %v1314_v62  ;;  %vm1320_vm0 = vweird.f32 %v1314_v62 }
 0x339   : > { %v1169_v63 = vsub.f32 1.0, %v1168_v61 }
 0x33a   : > { %v1327_v32 = vor.u32 1.1754944e-38, %v1326_v10 }
 0x33b   : > { %v1170_v2 = vmul.f32 %v2053_v59, %v1169_v63 }
 0x33d   : > { %v1171_v3 = vadd.f32 %v2053_v59, %v1170_v2 }
 0x33e   : > { %v2055_v6 = vpop.eup %2054 }
 0x33f   : > { %v1175_v9 = vsel %vm1174_vm10, %v2053_v59, %v1171_v3  ;;  %v1316_v13 = vmul.f32 %v2055_v6, %v1314_v62  ;;  %vm1321_vm15 = vweird.f32 %v2055_v6  ;;  %vm987_vm10 = vcmask 195712  }
 0x340   : > { %v1180_v12 = vsel %vm1177_vm11, %v1179_v7, %v1175_v9  ;;  %vm1322_vm4 = vmor %vm1320_vm0, %vm1321_vm15  ;;  %v1915_v9 = vld [vmem:[%s2560_s14] sm:$0xff] }
 0x341   : > { %v1181_v15 = vmul.f32 %v2679_v46, %v1180_v12  ;;  %v1317_v16 = vsub.f32 1.0, %v1316_v13  ;;  %v1324_v46 = vand.u32 2147483647, %v1314_v62  ;;  %1390 = vmatpush.bf16.msra.mxu0 %v1915_v9 }
 0x342   : > { %v1184_v17 = vpop.permute.xlu0 %1183 }
 0x343   : > { %v1318_v20 = vmul.f32 %v2055_v6, %v1317_v16  ;;  %v1189_v21 = vsel %vm821_vm3, %v1184_v17, 0  ;;  %v1182_v23 = vpack.c.bf16 %v1181_v15, %v1181_v15  ;;  %vm1325_vm5 = vcmp.eq.f32.partialorder %v1324_v46, 8.507059e+37 }
 0x344   : > { %1198 = vmatpush.bf16.msrb.mxu2 %v1189_v21  ;;  %v2312_v46 = vmov 32.0  }
 0x345   : > { %v1319_v18 = vadd.f32 %v2055_v6, %v1318_v20 }
 0x347   : > { %1864 = vmatmul.msk.bf16.vlgmr.msrb.gmra.mxu2 %vm771_vm2, %v1182_v23  ;;  %v1323_v30 = vsel %vm1322_vm4, %v2055_v6, %v1319_v18 }
 0x348   : > { %v1328_v35 = vsel %vm1325_vm5, %v1327_v32, %v1323_v30  ;;  %vm1539_vm5 = vcmask 523264  }
 0x349   : > { %v1240_v27 = vpop.xlane.xlu1 %1239  ;;  %v1329_v38 = vmul.f32 %v2683_v49, %v1328_v35 }
 0x34a   : > { %2056 = vrcp.f32 %v1240_v27  ;;  %v1114_v29 = vpop.permute.xlu0 %1113  ;;  %v1252_v42 = vand.u32 2147483648, %v1240_v27  ;;  %v1250_v43 = vand.u32 2147483647, %v1240_v27  ;;  %vm1246_vm7 = vweird.f32 %v1240_v27 }
 0x34b   : > { %v1119_v31 = vsel %vm821_vm3, %v1114_v29, 0  ;;  %v1330_v44 = vpack.c.bf16 %v1329_v38, %v1329_v38  ;;  %2058 = vrcp.f32 %v2312_v46 }
 0x34c   : > { %1128 = vmatpush.bf16.msra.mxu1 %v1119_v31  ;;  %v1253_v47 = vor.u32 1.1754944e-38, %v1252_v42  ;;  %vm1251_vm9 = vcmp.eq.f32.partialorder %v1250_v43, 8.507059e+37  ;;  %v1918_v43 = vld [vmem:[%s2569_s0 + $0x8] sm:$0xff] }
 0x34f   : > { %1862 = vmatmul.msk.bf16.vlgmr.msra.gmra.mxu1 %vm771_vm2, %v1112_v33 }
 0x350   : > { %v2057_v36 = vpop.eup %2056 }
 0x351   : > { %v1242_v34 = vmul.f32 %v2057_v36, %v1240_v27  ;;  %vm1247_vm6 = vweird.f32 %v2057_v36  ;;  %v2059_v27 = vpop.eup %2058 }
 0x352   : > { %v1332_v39 = vpop.permute.xlu0 %1331  ;;  %vm1248_vm8 = vmor %vm1246_vm7, %vm1247_vm6  ;;  %v1406_v29 = vmul.f32 32.0, %v2059_v27  ;;  %vm1410_vm11 = vweird.f32 %v2059_v27 }
 0x353   : > { %v1243_v40 = vsub.f32 1.0, %v1242_v34  ;;  %v1337_v41 = vsel %vm821_vm3, %v1332_v39, 0 }
 0x354   : > { %1346 = vmatpush.bf16.msra.mxu2 %v1337_v41  ;;  %v1407_v30 = vsub.f32 1.0, %v1406_v29 }
 0x355   : > { %v1244_v26 = vmul.f32 %v2057_v36, %v1243_v40 }
 0x356   : > { %v1408_v31 = vmul.f32 %v2059_v27, %v1407_v30 }
 0x357   : > { %v1245_v45 = vadd.f32 %v2057_v36, %v1244_v26  ;;  %1868 = vmatmul.msk.bf16.vlgmr.msra.gmra.mxu2 %vm771_vm2, %v1330_v44 }
 0x358   : > { %v1409_v32 = vadd.f32 %v2059_v27, %v1408_v31 }
 0x359   : > { %v1249_v48 = vsel %vm1248_vm8, %v2057_v36, %v1245_v45 }
 0x35a   : > { %v1254_v49 = vsel %vm1251_vm9, %v1253_v47, %v1249_v48  ;;  %v1258_v50 = vpop.permute.xlu0 %1257  ;;  %v1917_v47 = vld [vmem:[%s2569_s0] sm:$0xff] }
 0x35b   : > { %v1255_v51 = vmul.f32 %v2690_v54, %v1254_v49  ;;  %v1263_v52 = vsel %vm821_vm3, %v1258_v50, 0  ;;  %vm912_vm3 = vcmask 130112  }
 0x35c   : > { %1272 = vmatpush.bf16.msrb.mxu1 %v1263_v52 }
 0x35d   : > { %v1256_v53 = vpack.c.bf16 %v1255_v51, %v1255_v51 }
 0x35f   : > { %1866 = vmatmul.msk.bf16.vlgmr.msrb.gmra.mxu1 %vm771_vm2, %v1256_v53 }
 0x360   : > { %1492 = vmatpush.bf16.msra.mxu1 %v1918_v43 }
 0x364   : > { %1493 = vmatpush.bf16.msra.mxu1 %v1917_v47 }
 0x37f   : > { %v834_v55 = vpop.f32.mrf.mxu2 }
 0x380   : > { %838 = vst.msk [vmem:[#allocation3] sm:$0xff] %vm771_vm2, %v834_v55 }
 0x381   : > { %v979_v28 = vpop.f32.mrf.mxu1 }
 0x382   : > { %984 = vrot.lane.b32.xlu0 %v979_v28, %s2309_s12 }
 0x387   : > { %v836_v56 = vpop.f32.mrf.mxu2 }
 0x389   : > { %v981_v57 = vpop.f32.mrf.mxu1 }
 0x38f   : > { %v904_v58 = vpop.f32.mrf.mxu2 }
 0x390   : > { %909 = vrot.lane.b32.xlu2 %v904_v58, %s2310_s25 }
 0x397   : > { %v906_v59 = vpop.f32.mrf.mxu2 }
 0x39f   : > { %v1054_v54 = vpop.f32.mrf.mxu2 }
 0x3a7   : > { %v1056_v60 = vpop.f32.mrf.mxu2 }
 0x3ca   : > { %v1200_v61 = vpop.f32.mrf.mxu2 }
 0x3cb   : > { %1205 = vrot.lane.b32.xlu1 %v1200_v61, %s2310_s25 }
 0x3cc   : > { %v1130_v62 = vpop.f32.mrf.mxu1 }
 0x3cd   : > { %1134 = vst.msk [vmem:[#allocation3 + $0x8] sm:$0xff] %vm771_vm2, %v1130_v62  ;;  %vm1062_vm2 = vcmask 261312   ;;  %v2020_v62 = vld [vmem:[%s2862_s28] ss:$0 sm:$0xff] }
 0x3d2   : > { %v1202_v63 = vpop.f32.mrf.mxu2 }
 0x3d4   : > { %v1132_v0 = vpop.f32.mrf.mxu1 }
 0x3da   : > { %v1348_v1 = vpop.f32.mrf.mxu2 }
 0x3db   : > { %1353 = vrot.lane.b32.xlu2 %v1348_v1, %s2311_s1 }
 0x3dc   : > { %v1274_v2 = vpop.f32.mrf.mxu1 }
 0x3dd   : > { %1279 = vrot.lane.b32.xlu0 %v1274_v2, %s2309_s12  ;;  %v2021_v2 = vld [vmem:[%s585_s9] ss:$0 sm:$0xff] }
 0x3e2   : > { %v1350_v37 = vpop.f32.mrf.mxu2 }
 0x3e4   : > { %v1276_v3 = vpop.f32.mrf.mxu1 }
 0x3e5   : > { %1059 = vrot.lane.b32.xlu0 %v1054_v54, %s2311_s1 }
 0x3ea   : > { %v910_v6 = vpop.permute.xlu2 %909 }
 0x3eb   : > { %913 = vst.msk [vmem:[#allocation3] sm:$0xff] %vm912_vm3, %v910_v6 }
 0x3f4   : > { %v985_v7 = vpop.permute.xlu0 %984 }
 0x3f5   : > { %988 = vst.msk [vmem:[#allocation3] sm:$0xff] %vm987_vm10, %v985_v7 }
 0x435   : > { %v1354_v12 = vpop.permute.xlu2 %1353 }
 0x43d   : > { %v1206_v13 = vpop.permute.xlu1 %1205 }
 0x43e   : > { %1208 = vst.msk [vmem:[#allocation3 + $0x8] sm:$0xff] %vm912_vm3, %v1206_v13  ;;  %v1922_v13 = vld [vmem:[%s2579_s29 + $0x18] sm:$0xff] }
 0x43f   : > { %1547 = vmatpush.bf16.msra.mxu3 %v1922_v13 }
 0x44f   : > { %v1280_v11 = vpop.permute.xlu0 %1279 }
 0x450   : > { %1282 = vst.msk [vmem:[#allocation3 + $0x8] sm:$0xff] %vm987_vm10, %v1280_v11  ;;  %v1921_v11 = vld [vmem:[%s2579_s29 + $0x10] sm:$0xff] }
 0x451   : > { %1356 = vst.msk [vmem:[#allocation3 + $0x8] sm:$0xff] %vm1062_vm2, %v1354_v12  ;;  %1548 = vmatpush.bf16.msra.mxu3 %v1921_v11  ;;  %v1920_v12 = vld [vmem:[%s2579_s29 + $0x8] sm:$0xff] }
 0x455   : > { %1549 = vmatpush.bf16.msra.mxu3 %v1920_v12 }
 0x457   : > { %v1060_v14 = vpop.permute.xlu0 %1059 }
 0x458   : > { %1063 = vst.msk [vmem:[#allocation3] sm:$0xff] %vm1062_vm2, %v1060_v14  ;;  %v1358_v16 = vld [vmem:[#allocation3 + $0x8] sm:$0xff]  ;;  %v1919_v14 = vld [vmem:[%s2579_s29] sm:$0xff] }
 0x459   : > { %1550 = vmatpush.bf16.msra.mxu3 %v1919_v14 }
 0x45f   : > { %v1357_v15 = vld [vmem:[#allocation3] sm:$0xff] }
 0x460   : > { %v1359_v17 = vpack.c.bf16 %v1358_v16, %v1357_v15  ;;  %v2022_v16 = vld [vmem:[%s700_s18] ss:$0 sm:$0xff] }
 0x462   : > { %1877 = vmatmul.msk.bf16.vlgmr.msra.gmra.mxu0 %vm748_vm1, %v1359_v17 }
 0x4df   : > { %v1392_v20 = vpop.f32.mrf.mxu0 }
 0x4e0   : > { %v1393_v21 = vadd.f32 %v2019_v19, %v1392_v20 }
 0x4e2   : > { %v1397_v22 = vadd.f32 %v1393_v21, %v2593_v4  ;;  %v2745_v4 = vsel %vm1410_vm11, %v2059_v27, %v1409_v32 }
 0x4e4   : > { %v1399_v23 = vsel %vm748_vm1, %v1397_v22, 0.0 }
 0x4e5   : > { %1400 = vadd.xlane.f32.xlu0 %v1399_v23 }
 0x4e7   : > { %v1394_v24 = vpop.f32.mrf.mxu0 }
 0x4e8   : > { %v1395_v18 = vadd.f32 %v2019_v19, %v1394_v24  ;;  %v2023_v24 = vld [vmem:[%s708_s21] ss:$0 sm:$0xff] }
 0x4ea   : > { %v1398_v10 = vadd.f32 %v1395_v18, %v2595_v5 }
 0x4ec   : > { %v1402_v25 = vsel %vm748_vm1, %v1398_v10, 0.0 }
 0x4ed   : > { %1403 = vadd.xlane.f32.xlu1 %v1402_v25 }
 0x558   : > { %v1401_v33 = vpop.xlane.xlu0 %1400 }
 0x559   : > { %v1412_v35 = vmul.f32 %v2745_v4, %v1401_v33 }
 0x55b   : > { %v1414_v36 = vsub.f32 %v1397_v22, %v1412_v35 }
 0x55d   : > { %v1416_v5 = vmul.f32 %v1414_v36, %v1414_v36 }
 0x55f   : > { %v1418_v38 = vsel %vm748_vm1, %v1416_v5, 0.0 }
 0x560   : > { %v1404_v34 = vpop.xlane.xlu1 %1403  ;;  %1419 = vadd.xlane.f32.xlu2 %v1418_v38 }
 0x561   : > { %v1413_v39 = vmul.f32 %v2745_v4, %v1404_v34 }
 0x563   : > { %v1415_v40 = vsub.f32 %v1398_v10, %v1413_v39 }
 0x565   : > { %v1417_v41 = vmul.f32 %v1415_v40, %v1415_v40 }
 0x567   : > { %v1421_v42 = vsel %vm748_vm1, %v1417_v41, 0.0 }
 0x568   : > { %1422 = vadd.xlane.f32.xlu0 %v1421_v42 }
 0x5d3   : > { %v1420_v26 = vpop.xlane.xlu2 %1419 }
 0x5d4   : > { %v1424_v44 = vmul.f32 %v1420_v26, %v2745_v4 }
 0x5d6   : > { %v1426_v45 = vadd.f32 1e-05, %v1424_v44 }
 0x5d8   : > { %2060 = vrsqrt.f32 %v1426_v45  ;;  %vm1434_vm13 = vweird.f32 %v1426_v45 }
 0x5db   : > { %v1423_v48 = vpop.xlane.xlu0 %1422 }
 0x5dc   : > { %v1425_v49 = vmul.f32 %v1423_v48, %v2745_v4 }
 0x5de   : > { %v2061_v50 = vpop.eup %2060  ;;  %v1427_v51 = vadd.f32 1e-05, %v1425_v49 }
 0x5df   : > { %v1429_v52 = vmul.f32 %v2061_v50, %v1426_v45  ;;  %vm1435_vm12 = vweird.f32 %v2061_v50 }
 0x5e0   : > { %2062 = vrsqrt.f32 %v1427_v51  ;;  %vm1436_vm14 = vmor %vm1434_vm13, %vm1435_vm12  ;;  %vm1444_vm0 = vweird.f32 %v1427_v51 }
 0x5e1   : > { %v1430_v53 = vmul.f32 %v2061_v50, %v1429_v52 }
 0x5e3   : > { %v1431_v55 = vmul.f32 0.5, %v1430_v53 }
 0x5e5   : > { %v1432_v28 = vsub.f32 1.5, %v1431_v55 }
 0x5e6   : > { %v2063_v56 = vpop.eup %2062 }
 0x5e7   : > { %v1433_v57 = vmul.f32 %v2061_v50, %v1432_v28  ;;  %v1439_v58 = vmul.f32 %v2063_v56, %v1427_v51  ;;  %vm1445_vm15 = vweird.f32 %v2063_v56 }
 0x5e8   : > { %vm1446_vm4 = vmor %vm1444_vm0, %vm1445_vm15 }
 0x5e9   : > { %v1440_v59 = vmul.f32 %v2063_v56, %v1439_v58  ;;  %v1437_v54 = vsel %vm1436_vm14, %v2061_v50, %v1433_v57  ;;  %v2025_v58 = vld [vmem:[%s594_s15] ss:$0 sm:$0xff] }
 0x5ea   : > { %v1448_v63 = vmul.f32 %v1437_v54, %v1414_v36 }
 0x5eb   : > { %v1441_v60 = vmul.f32 0.5, %v1440_v59 }
 0x5ec   : > { %v1454_v37 = vmul.f32 %v2020_v62, %v1448_v63 }
 0x5ed   : > { %v1442_v61 = vsub.f32 1.5, %v1441_v60 }
 0x5ee   : > { %v1460_v7 = vadd.f32 %v2021_v2, %v1454_v37 }
 0x5ef   : > { %v1443_v0 = vmul.f32 %v2063_v56, %v1442_v61 }
 0x5f1   : > { %v1447_v1 = vsel %vm1446_vm4, %v2063_v56, %v1443_v0  ;;  %v2024_v56 = vld [vmem:[%s711_s19] ss:$0 sm:$0xff] }
 0x5f2   : > { %v1449_v3 = vmul.f32 %v1447_v1, %v1415_v40 }
 0x5f4   : > { %v1455_v6 = vmul.f32 %v2020_v62, %v1449_v3 }
 0x5f6   : > { %v1461_v8 = vadd.f32 %v2021_v2, %v1455_v6 }
 0x5f8   : > { %v1462_v9 = vpack.c.bf16 %v1461_v8, %v1460_v7 }
 0x5fa   : > { %1886 = vmatmul.msk.bf16.vlgmr.msra.gmra.mxu1 %vm748_vm1, %v1462_v9 }
 0x677   : > { %v1495_v15 = vpop.f32.mrf.mxu1 }
 0x678   : > { %v1496_v17 = vadd.f32 %v2022_v16, %v1495_v15 }
 0x67a   : > { %v1500_v21 = vmax.f32 %v1496_v17, 0.0 }
 0x67f   : > { %v1497_v19 = vpop.f32.mrf.mxu1 }
 0x680   : > { %v1498_v20 = vadd.f32 %v2022_v16, %v1497_v19 }
 0x682   : > { %v1501_v22 = vmax.f32 %v1498_v20, 0.0 }
 0x684   : > { %v1502_v23 = vpack.c.bf16 %v1501_v22, %v1500_v21 }
 0x686   : > { %1903 = vmatmul.msk.bf16.vlgmr.msra.gmra.mxu3 %vm1539_vm5, %v1502_v23 }
 0x709   : > { %v1552_v18 = vpop.f32.mrf.mxu3 }
 0x70a   : > { %v1553_v10 = vadd.f32 %v2023_v24, %v1552_v18 }
 0x70c   : > { %v1557_v25 = vadd.f32 %v1553_v10, %v1460_v7 }
 0x70e   : > { %v1559_v46 = vsel %vm748_vm1, %v1557_v25, 0.0 }
 0x70f   : > { %1560 = vadd.xlane.f32.xlu1 %v1559_v46 }
 0x711   : > { %v1554_v27 = vpop.f32.mrf.mxu3 }
 0x712   : > { %v1555_v29 = vadd.f32 %v2023_v24, %v1554_v27 }
 0x714   : > { %v1558_v30 = vadd.f32 %v1555_v29, %v1461_v8 }
 0x716   : > { %v1562_v31 = vsel %vm748_vm1, %v1558_v30, 0.0 }
 0x717   : > { %1563 = vadd.xlane.f32.xlu2 %v1562_v31 }
 0x782   : > { %v1561_v32 = vpop.xlane.xlu1 %1560 }
 0x783   : > { %v1565_v33 = vmul.f32 %v1561_v32, %v2745_v4 }
 0x785   : > { %v1567_v35 = vsub.f32 %v1557_v25, %v1565_v33 }
 0x787   : > { %v1569_v36 = vmul.f32 %v1567_v35, %v1567_v35 }
 0x789   : > { %v1571_v5 = vsel %vm748_vm1, %v1569_v36, 0.0 }
 0x78a   : > { %v1564_v38 = vpop.xlane.xlu2 %1563  ;;  %1572 = vadd.xlane.f32.xlu0 %v1571_v5 }
 0x78b   : > { %v1566_v34 = vmul.f32 %v1564_v38, %v2745_v4 }
 0x78d   : > { %v1568_v39 = vsub.f32 %v1558_v30, %v1566_v34 }
 0x78f   : > { %v1570_v40 = vmul.f32 %v1568_v39, %v1568_v39 }
 0x791   : > { %v1574_v41 = vsel %vm748_vm1, %v1570_v40, 0.0 }
 0x792   : > { %1575 = vadd.xlane.f32.xlu1 %v1574_v41 }
 0x7fd   : > { %v1573_v42 = vpop.xlane.xlu0 %1572 }
 0x7fe   : > { %v1577_v26 = vmul.f32 %v1573_v42, %v2745_v4 }
 0x800   : > { %v1579_v43 = vadd.f32 1e-05, %v1577_v26 }
 0x802   : > { %2064 = vrsqrt.f32 %v1579_v43  ;;  %vm1587_vm7 = vweird.f32 %v1579_v43 }
 0x805   : > { %v1576_v44 = vpop.xlane.xlu1 %1575 }
 0x806   : > { %v1578_v45 = vmul.f32 %v1576_v44, %v2745_v4 }
 0x808   : > { %v2065_v47 = vpop.eup %2064  ;;  %v1580_v48 = vadd.f32 1e-05, %v1578_v45 }
 0x809   : > { %v1582_v49 = vmul.f32 %v2065_v47, %v1579_v43  ;;  %vm1588_vm6 = vweird.f32 %v2065_v47 }
 0x80a   : > { %2066 = vrsqrt.f32 %v1580_v48  ;;  %vm1589_vm8 = vmor %vm1587_vm7, %vm1588_vm6  ;;  %vm1597_vm3 = vweird.f32 %v1580_v48 }
 0x80b   : > { %v1583_v50 = vmul.f32 %v2065_v47, %v1582_v49 }
 0x80d   : > { %v1584_v51 = vmul.f32 0.5, %v1583_v50 }
 0x80f   : > { %v1585_v52 = vsub.f32 1.5, %v1584_v51 }
 0x810   : > { %v2067_v53 = vpop.eup %2066 }
 0x811   : > { %v1586_v55 = vmul.f32 %v2065_v47, %v1585_v52  ;;  %v1592_v28 = vmul.f32 %v2067_v53, %v1580_v48  ;;  %vm1598_vm9 = vweird.f32 %v2067_v53 }
 0x812   : > { %vm1599_vm10 = vmor %vm1597_vm3, %vm1598_vm9 }
 0x813   : > { %v1590_v4 = vsel %vm1589_vm8, %v2065_v47, %v1586_v55  ;;  %v1593_v57 = vmul.f32 %v2067_v53, %v1592_v28 }
 0x814   : > { %v1601_v59 = vmul.f32 %v1590_v4, %v1567_v35 }
 0x815   : > { %v1594_v54 = vmul.f32 0.5, %v1593_v57 }
 0x816   : > { %v1607_v60 = vmul.f32 %v2024_v56, %v1601_v59 }
 0x817   : > { %v1595_v61 = vsub.f32 1.5, %v1594_v54 }
 0x818   : > { %v1613_v62 = vadd.f32 %v2025_v58, %v1607_v60 }
 0x819   : > { %v1596_v63 = vmul.f32 %v2067_v53, %v1595_v61 }
 0x81a   : > { %1615 = vst.msk [vmem:[#allocation2] sm:$0xff] %vm748_vm1, %v1613_v62 }
 0x81b   : > { %v1600_v0 = vsel %vm1599_vm10, %v2067_v53, %v1596_v63 }
 0x81c   : > { %v1602_v1 = vmul.f32 %v1600_v0, %v1568_v39 }
 0x81e   : > { %v1608_v2 = vmul.f32 %v2024_v56, %v1602_v1  ;;  %1620 = sbr.rel (%p1904_p5) target bundleno = 2091 (0x82b), region = 104 }
 0x820   : > { %v1614_v37 = vadd.f32 %v2025_v58, %v1608_v2 }
 0x822   : > { %1616 = vst.msk [vmem:[#allocation2 + $0x8] sm:$0xff] %vm748_vm1, %v1614_v37 }
 0x823   : > { %v1621_v3 = vld [vmem:[#allocation2] sm:$0xff] }
 0x824   : > { %1623 = vst.msk [vmem:[#allocation12] sm:$0xff] %vm748_vm1, %v1621_v3 }
 0x829   : > { %v1622_v6 = vld [vmem:[#allocation2 + $0x8] sm:$0xff] }
 0x82a   : > { %1624 = vst.msk [vmem:[#allocation12 + $0x8] sm:$0xff] %vm748_vm1, %v1622_v6 }
 0x82b PF: > { %p1963_p0 = scmp.eq.s32.totalorder %s2409_s17, 1  ;;  %s2313_s16 = smov [#allocation12]  }
 0x82c   : > { %s1630_s11 = sshll.u32 %s2313_s16, 4  ;;  %s2866_s10 = sld [smem:[#allocation29_spill]]  ;;  %s1631_s11 = int_to_ptr.vmem [resolvable:$true] %s1630_s11 }
 0x82d   : > { %s2314_s12 = smov 128  }
 0x832   : > { %s1632_s26 = sshll.u32 %s2866_s10, 4  ;;  %s1633_s26 = int_to_ptr.hbm [resolvable:$true] %s1632_s26 }
 0x833   : > { %1938 = dma.vmem_to_hbm [thread:$0]  (%p1963_p0), %s1631_s11, 256, %s1633_s26, [#allocation6], %s2314_s12, %s2314_s12, %s2310_s25  }
 0x834   : > { %2275 = dma.done.wait (%p1963_p0), [#allocation6], 256  }
 0x835   : > { %2277 = vsyncadd (%p1963_p0), [#allocation6], 4294967040 }
 0x836 PF: > { %s2867_s16 = sld [smem:[#allocation18_spill]]  ;;  %s2870_s29 = smov %s2284_s30 }
 0x837   : > { %s2868_s1 = sld [smem:[#allocation17_spill]] }
 0x838   : > { %s2869_s15 = sld [smem:[#allocation19_spill]] }
 0x83c   : > { %p24_p3 = scmp.ge.s32.totalorder %s2867_s16, 4  }
 0x83d   : > { %s2871_s30 = smov %s2868_s1 }
 0x83e   :  { %26 = sbr.rel (!%p24_p3) target bundleno = 15 (0xf), region = 177 }
 0x843   :  { %1649 = vsyncpa [#allocation5], 1 }
 0x844   :  { %1651 = vsyncpa [#allocation5 + $0x1], 1 }
 0x845   :  { %1652 = vsyncpa [#allocation8], 1 }
 0x846   :  { %1653 = vsyncpa [#allocation6], 1 }
 0x847   :  { %1655 = vsyncpa [#allocation6 + $0x1], 1 }

</bundles_post_ra>
